<compile_context>
chip_gen: v7x
topology: tpu7x:2x2x1
jax: 0.10.0
libtpu: 0.0.40
codegen_flags: <defaults>
</compile_context>

<pallas_src>
import math

import jax
import jax.numpy as jnp
from jax.experimental import pallas as pl
from jax.experimental.pallas import tpu as pltpu

# ---------------------------------------------------------------------------
# Small synthetic XLM-R config (matches XLMRobertaModel(xlmr_config) semantics)
# ---------------------------------------------------------------------------
VOCAB = 100
HIDDEN = 32
HEADS = 2
HEAD_DIM = HIDDEN // HEADS
FFN = 64
LAYERS = 2
MAX_POS = 64
PAD_IDX = 1          # XLM-R padding_idx
EPS = 1e-5
NEG_INF = -1e9

LANES = 128          # weight-slab lane width (one vreg lane extent)
NUM_LN = 1 + 2 * LAYERS


def _build_layout():
    """Static row layout of the packed weight slab.  Every segment starts on an
    8-row boundary so in-kernel static slices stay sublane-aligned."""
    layout = {}
    row = 0

    def alloc(name, nrows):
        nonlocal row
        layout[name] = row
        row += (nrows + 7) // 8 * 8

    alloc("ln_g", NUM_LN)
    alloc("ln_b", NUM_LN)
    for l in range(LAYERS):
        alloc(f"wqkv{l}", HIDDEN)   # (H, 3H)
        alloc(f"bqkv{l}", 1)        # (1, 3H)
        alloc(f"wo{l}", HIDDEN)     # (H, H)
        alloc(f"bo{l}", 1)          # (1, H)
        alloc(f"w1{l}", HIDDEN)     # (H, FFN)
        alloc(f"b1{l}", 1)          # (1, FFN)
        alloc(f"w2{l}", FFN)        # (FFN, H)
        alloc(f"b2{l}", 1)          # (1, H)
    return layout, row


LAYOUT, TOTAL_ROWS = _build_layout()


# ---------------------------------------------------------------------------
# Fused encoder kernel: embedding LN + LAYERS x (attention + LN + FFN + LN)
# ---------------------------------------------------------------------------
def encoder_kernel(x_ref, bias_ref, w_ref, o_ref):
    f32 = jnp.float32

    x = x_ref[...]           # (N, H)  summed embeddings, N = B*S
    bias = bias_ref[...]     # (N, N)  additive attention bias (padding + batch block-diag)

    def blk(name, nrows, ncols):
        r0 = LAYOUT[name]    # static Python int -> zero-cost static slice
        return w_ref[r0:r0 + nrows, :ncols]

    def ln(v, idx):          # idx is a static Python int
        g = w_ref[LAYOUT["ln_g"] + idx:LAYOUT["ln_g"] + idx + 1, :HIDDEN]  # (1, H)
        b = w_ref[LAYOUT["ln_b"] + idx:LAYOUT["ln_b"] + idx + 1, :HIDDEN]  # (1, H)
        mu = jnp.mean(v, axis=-1, keepdims=True)
        var = jnp.mean((v - mu) ** 2, axis=-1, keepdims=True)
        return (v - mu) * jax.lax.rsqrt(var + EPS) * g + b

    h = ln(x, 0)                             # embedding LayerNorm

    for l in range(LAYERS):                  # static unroll (LAYERS = 2)
        # ----- fused QKV projection: one (N,H) @ (H,3H) matmul per layer -----
        wqkv = blk(f"wqkv{l}", HIDDEN, 3 * HIDDEN)
        bqkv = blk(f"bqkv{l}", 1, 3 * HIDDEN)
        qkv = jnp.dot(h, wqkv, preferred_element_type=f32) + bqkv   # (N, 3H)

        # ----- per-head attention on flat 2-D operands -----------------------
        ctx_heads = []
        for hd in range(HEADS):              # static unroll (HEADS = 2)
            q = qkv[:, hd * HEAD_DIM:(hd + 1) * HEAD_DIM]                        # (N, Dh), pre-scaled
            k = qkv[:, HIDDEN + hd * HEAD_DIM:HIDDEN + (hd + 1) * HEAD_DIM]      # (N, Dh)
            v = qkv[:, 2 * HIDDEN + hd * HEAD_DIM:2 * HIDDEN + (hd + 1) * HEAD_DIM]
            # scores: q @ k^T via dot_general contracting the Dh axes -> (N, N)
            s = jax.lax.dot_general(q, k, (((1,), (1,)), ((), ())),
                                    preferred_element_type=f32) + bias
            s = s - jnp.max(s, axis=-1, keepdims=True)
            p = jnp.exp(s)
            p = p * pl.reciprocal(jnp.sum(p, axis=-1, keepdims=True), approx=False)
            ctx_heads.append(jnp.dot(p, v, preferred_element_type=f32))          # (N, Dh)
        ctx = jnp.concatenate(ctx_heads, axis=-1)                                # (N, H)

        # ----- fused output projection: one (N,H) @ (H,H) matmul -------------
        wo = blk(f"wo{l}", HIDDEN, HIDDEN)
        bo = blk(f"bo{l}", 1, HIDDEN)
        attn = jnp.dot(ctx, wo, preferred_element_type=f32) + bo
        h = ln(attn + h, 1 + 2 * l)

        # ----- feed-forward (exact erf GELU, matching HF "gelu") -------------
        w1 = blk(f"w1{l}", HIDDEN, FFN)
        b1 = blk(f"b1{l}", 1, FFN)
        w2 = blk(f"w2{l}", FFN, HIDDEN)
        b2 = blk(f"b2{l}", 1, HIDDEN)
        f = jnp.dot(h, w1, preferred_element_type=f32) + b1
        f = 0.5 * f * (1.0 + jax.lax.erf(f * (1.0 / math.sqrt(2.0))))
        f = jnp.dot(f, w2, preferred_element_type=f32) + b2
        h = ln(f + h, 2 + 2 * l)

    # Output kept as (B*S, H): a single 2 KB store; a lane-dense relayout would
    # cost more than the masked-store savings at this size.
    o_ref[...] = h.astype(o_ref.dtype)


# ---------------------------------------------------------------------------
# Parameter init (raw, reference layout) and packing for the fused kernel
# ---------------------------------------------------------------------------
def init_params(key):
    def nrm(k, shape):
        return jax.random.normal(k, shape, jnp.float32) * 0.02

    n_keys = 3 + LAYERS * 6
    keys = list(jax.random.split(key, n_keys))
    ki = iter(keys)

    params = {
        "word_emb": nrm(next(ki), (VOCAB, HIDDEN)).at[PAD_IDX].set(0.0),
        "pos_emb": nrm(next(ki), (MAX_POS, HIDDEN)),
        "type_emb": nrm(next(ki), (1, HIDDEN)),
        "emb_ln_g": jnp.ones((HIDDEN,), jnp.float32),
        "emb_ln_b": jnp.zeros((HIDDEN,), jnp.float32),
        "layers": [],
    }
    for _ in range(LAYERS):
        kq, kk, kv, ko, k1, k2 = jax.random.split(next(ki), 6)
        params["layers"].append({
            "wq": nrm(kq, (HIDDEN, HIDDEN)), "bq": jnp.zeros((HIDDEN,), jnp.float32),
            "wk": nrm(kk, (HIDDEN, HIDDEN)), "bk": jnp.zeros((HIDDEN,), jnp.float32),
            "wv": nrm(kv, (HIDDEN, HIDDEN)), "bv": jnp.zeros((HIDDEN,), jnp.float32),
            "wo": nrm(ko, (HIDDEN, HIDDEN)), "bo": jnp.zeros((HIDDEN,), jnp.float32),
            "attn_ln_g": jnp.ones((HIDDEN,), jnp.float32),
            "attn_ln_b": jnp.zeros((HIDDEN,), jnp.float32),
            "w1": nrm(k1, (HIDDEN, FFN)), "b1": jnp.zeros((FFN,), jnp.float32),
            "w2": nrm(k2, (FFN, HIDDEN)), "b2": jnp.zeros((HIDDEN,), jnp.float32),
            "ffn_ln_g": jnp.ones((HIDDEN,), jnp.float32),
            "ffn_ln_b": jnp.zeros((HIDDEN,), jnp.float32),
        })
    return params


def pack_params(params):
    """One-time weight prep: concatenate every weight / bias / LN parameter
    into a single lane-padded (TOTAL_ROWS, 128) f32 slab and fold the attention
    scale 1/sqrt(HEAD_DIM) into the Q block of the fused QKV weight/bias."""
    scale = 1.0 / math.sqrt(HEAD_DIM)
    slab = jnp.zeros((TOTAL_ROWS, LANES), jnp.float32)

    def put(slab, name, arr):
        arr = jnp.asarray(arr, jnp.float32)
        if arr.ndim == 1:
            arr = arr[None, :]
        r0 = LAYOUT[name]
        nrows, ncols = arr.shape
        return slab.at[r0:r0 + nrows, :ncols].set(arr)

    ln_g = jnp.stack([params["emb_ln_g"]]
                     + [p[k] for p in params["layers"] for k in ("attn_ln_g", "ffn_ln_g")])
    ln_b = jnp.stack([params["emb_ln_b"]]
                     + [p[k] for p in params["layers"] for k in ("attn_ln_b", "ffn_ln_b")])
    slab = put(slab, "ln_g", ln_g)
    slab = put(slab, "ln_b", ln_b)

    for l, lp in enumerate(params["layers"]):
        wqkv = jnp.concatenate([lp["wq"] * scale, lp["wk"], lp["wv"]], axis=1)   # (H, 3H)
        bqkv = jnp.concatenate([lp["bq"] * scale, lp["bk"], lp["bv"]], axis=0)   # (3H,)
        slab = put(slab, f"wqkv{l}", wqkv)
        slab = put(slab, f"bqkv{l}", bqkv)
        slab = put(slab, f"wo{l}", lp["wo"])
        slab = put(slab, f"bo{l}", lp["bo"])
        slab = put(slab, f"w1{l}", lp["w1"])
        slab = put(slab, f"b1{l}", lp["b1"])
        slab = put(slab, f"w2{l}", lp["w2"])
        slab = put(slab, f"b2{l}", lp["b2"])

    return {
        "word_emb": params["word_emb"],
        "pos_emb": params["pos_emb"],
        "type_emb": params["type_emb"],
        "slab": slab,
    }


# ---------------------------------------------------------------------------
# Forward pass: embedding gather in JAX, fused encoder in one pallas_call
# ---------------------------------------------------------------------------
def xlm_r_forward(packed, x, segs, mask):
    # segs accepted for signature parity but unused: the PyTorch forward calls
    # self.model(input_ids=x, attention_mask=mask) only.
    del segs
    B, S = x.shape
    N = B * S

    # XLM-R position ids: cumsum over non-pad tokens, offset by padding_idx.
    # TODO(synk): embedding gathers stay in plain JAX (data-dependent row gather
    # has no benefit as a Pallas kernel at this size).
    not_pad = (x != PAD_IDX).astype(jnp.int32)
    pos_ids = jnp.cumsum(not_pad, axis=1) * not_pad + PAD_IDX
    emb = (packed["word_emb"][x]
           + packed["pos_emb"][pos_ids]
           + packed["type_emb"][0])                     # token_type_ids == 0
    emb2d = emb.reshape(N, HIDDEN)                      # flatten outside kernel

    # Flat (N, N) additive attention bias: 0 where query i and key j are in the
    # same sequence AND key j is not padding, else -1e9 (applied before the
    # row-max subtraction inside the kernel).
    bidx = jnp.repeat(jnp.arange(B, dtype=jnp.int32), S)            # (N,)
    key_ok = mask.reshape(N).astype(bool)
    allow = (bidx[:, None] == bidx[None, :]) & key_ok[None, :]
    attn_bias = jnp.where(allow, 0.0, NEG_INF).astype(jnp.float32)  # (N, N)

    out = pl.pallas_call(
        encoder_kernel,
        out_shape=jax.ShapeDtypeStruct((N, HIDDEN), jnp.float32),
        # No grid, no BlockSpecs: single invocation; 3 operands, everything
        # (~210 KB) lives whole in VMEM, so there is no per-step pipeline or
        # multi-operand DMA-prologue overhead.
    )(emb2d, attn_bias, packed["slab"])

    return out.reshape(B, S, HIDDEN)   # top_vec == last_hidden_state


# ---------------------------------------------------------------------------
# Pure-JAX reference (for correctness check)
# ---------------------------------------------------------------------------
def ref_forward(params, x, segs, mask):
    del segs

    def ln(v, g, b):
        mu = v.mean(-1, keepdims=True)
        var = ((v - mu) ** 2).mean(-1, keepdims=True)
        return (v - mu) * jax.lax.rsqrt(var + EPS) * g + b

    not_pad = (x != PAD_IDX).astype(jnp.int32)
    pos_ids = jnp.cumsum(not_pad, axis=1) * not_pad + PAD_IDX
    h = (params["word_emb"][x] + params["pos_emb"][pos_ids] + params["type_emb"][0])
    h = ln(h, params["emb_ln_g"], params["emb_ln_b"])
    bias = ((1.0 - mask.astype(jnp.float32)) * NEG_INF)[:, None, None, :]  # (B,1,1,S)
    B, S, _ = h.shape
    for lp in params["layers"]:
        q = (h @ lp["wq"] + lp["bq"]).reshape(B, S, HEADS, HEAD_DIM).transpose(0, 2, 1, 3)
        k = (h @ lp["wk"] + lp["bk"]).reshape(B, S, HEADS, HEAD_DIM).transpose(0, 2, 1, 3)
        v = (h @ lp["wv"] + lp["bv"]).reshape(B, S, HEADS, HEAD_DIM).transpose(0, 2, 1, 3)
        s = q @ k.transpose(0, 1, 3, 2) / math.sqrt(HEAD_DIM) + bias
        p = jax.nn.softmax(s, axis=-1)
        ctx = (p @ v).transpose(0, 2, 1, 3).reshape(B, S, HIDDEN)
        a = ctx @ lp["wo"] + lp["bo"]
        h = ln(a + h, lp["attn_ln_g"], lp["attn_ln_b"])
        f = jax.nn.gelu(h @ lp["w1"] + lp["b1"], approximate=False) @ lp["w2"] + lp["b2"]
        h = ln(f + h, lp["ffn_ln_g"], lp["ffn_ln_b"])
    return h


# ---------------------------------------------------------------------------
if __name__ == "__main__":
    B, S = 2, 8
    key = jax.random.PRNGKey(0)
    k_par, k_ids = jax.random.split(key)

    params = init_params(k_par)
    packed = pack_params(params)

    x = jax.random.randint(k_ids, (B, S), minval=3, maxval=VOCAB, dtype=jnp.int32)
    # pad out the last two tokens of the second sequence
    x = x.at[1, -2:].set(PAD_IDX)
    mask = (x != PAD_IDX).astype(jnp.int32)
    segs = jnp.zeros((B, S), jnp.int32)   # unused by the forward pass

    fwd = jax.jit(xlm_r_forward)
    top_vec = jax.block_until_ready(fwd(packed, x, segs, mask))
    ref = jax.block_until_ready(ref_forward(params, x, segs, mask))

    assert top_vec.shape == (B, S, HIDDEN), top_vec.shape
    max_err = float(jnp.max(jnp.abs(top_vec - ref)))
    assert jnp.allclose(top_vec, ref, rtol=2e-3, atol=2e-3), max_err

    print("KERNEL_OK")
</pallas_src>

<mosaic_0001>
module attributes {stable_mosaic.version = 11 : i64} {
  func.func @encoder_kernel(%arg0: memref<16x32xf32, #tpu.memory_space<vmem>>, %arg1: memref<16x16xf32, #tpu.memory_space<vmem>>, %arg2: memref<400x128xf32, #tpu.memory_space<vmem>>, %arg3: memref<16x32xf32, #tpu.memory_space<vmem>>) attributes {dimension_semantics = [], scalar_prefetch = 0 : i64, scratch_operands = 0 : i64, tpu.core_type = #tpu.core_type<tc>} {
    %c0 = arith.constant 0 : index
    %c0_0 = arith.constant 0 : index
    %0 = vector.load %arg0[%c0, %c0_0] : memref<16x32xf32, #tpu.memory_space<vmem>>, vector<16x32xf32>
    %c0_1 = arith.constant 0 : index
    %c0_2 = arith.constant 0 : index
    %1 = vector.load %arg1[%c0_1, %c0_2] : memref<16x16xf32, #tpu.memory_space<vmem>>, vector<16x16xf32>
    %c0_3 = arith.constant 0 : index
    %c0_4 = arith.constant 0 : index
    %2 = vector.load %arg2[%c0_3, %c0_4] : memref<400x128xf32, #tpu.memory_space<vmem>>, vector<1x32xf32>
    %c8 = arith.constant 8 : index
    %c0_5 = arith.constant 0 : index
    %3 = vector.load %arg2[%c8, %c0_5] : memref<400x128xf32, #tpu.memory_space<vmem>>, vector<1x32xf32>
    %cst = arith.constant dense<0.000000e+00> : vector<16xf32>
    %4 = vector.multi_reduction <add>, %0, %cst [1] : vector<16x32xf32> to vector<16xf32>
    %5 = vector.shape_cast %4 : vector<16xf32> to vector<16x1xf32>
    %cst_6 = arith.constant 3.200000e+01 : f32
    %6 = vector.broadcast %cst_6 : f32 to vector<16x1xf32>
    %7 = arith.divf %5, %6 : vector<16x1xf32>
    %8 = vector.broadcast %7 : vector<16x1xf32> to vector<16x32xf32>
    %9 = arith.subf %0, %8 : vector<16x32xf32>
    %10 = arith.mulf %9, %9 : vector<16x32xf32>
    %cst_7 = arith.constant dense<0.000000e+00> : vector<16xf32>
    %11 = vector.multi_reduction <add>, %10, %cst_7 [1] : vector<16x32xf32> to vector<16xf32>
    %12 = vector.shape_cast %11 : vector<16xf32> to vector<16x1xf32>
    %cst_8 = arith.constant 3.200000e+01 : f32
    %13 = vector.broadcast %cst_8 : f32 to vector<16x1xf32>
    %14 = arith.divf %12, %13 : vector<16x1xf32>
    %15 = vector.broadcast %7 : vector<16x1xf32> to vector<16x32xf32>
    %16 = arith.subf %0, %15 : vector<16x32xf32>
    %cst_9 = arith.constant 9.99999974E-6 : f32
    %17 = vector.broadcast %cst_9 : f32 to vector<16x1xf32>
    %18 = arith.addf %14, %17 : vector<16x1xf32>
    %19 = math.rsqrt %18 : vector<16x1xf32>
    %20 = vector.broadcast %19 : vector<16x1xf32> to vector<16x32xf32>
    %21 = arith.mulf %16, %20 : vector<16x32xf32>
    %22 = vector.broadcast %2 : vector<1x32xf32> to vector<16x32xf32>
    %23 = arith.mulf %21, %22 : vector<16x32xf32>
    %24 = vector.broadcast %3 : vector<1x32xf32> to vector<16x32xf32>
    %25 = arith.addf %23, %24 : vector<16x32xf32>
    %c16 = arith.constant 16 : index
    %c0_10 = arith.constant 0 : index
    %26 = vector.load %arg2[%c16, %c0_10] : memref<400x128xf32, #tpu.memory_space<vmem>>, vector<32x96xf32>
    %c48 = arith.constant 48 : index
    %c0_11 = arith.constant 0 : index
    %27 = vector.load %arg2[%c48, %c0_11] : memref<400x128xf32, #tpu.memory_space<vmem>>, vector<1x96xf32>
    %cst_12 = arith.constant dense<0.000000e+00> : vector<16x96xf32>
    %28 = tpu.matmul %25, %26, %cst_12 {dimension_numbers = #tpu.dot_dimension_numbers<[1], [0], [0], [1], [0, 0, 1, 1], [], []>} : vector<16x32xf32>, vector<32x96xf32>, vector<16x96xf32> -> vector<16x96xf32>
    %29 = vector.broadcast %27 : vector<1x96xf32> to vector<16x96xf32>
    %30 = arith.addf %28, %29 : vector<16x96xf32>
    %31 = vector.extract_strided_slice %30 {offsets = [0, 0], sizes = [16, 16], strides = [1, 1]} : vector<16x96xf32> to vector<16x16xf32>
    %32 = vector.extract_strided_slice %30 {offsets = [0, 32], sizes = [16, 16], strides = [1, 1]} : vector<16x96xf32> to vector<16x16xf32>
    %33 = vector.extract_strided_slice %30 {offsets = [0, 64], sizes = [16, 16], strides = [1, 1]} : vector<16x96xf32> to vector<16x16xf32>
    %cst_13 = arith.constant dense<0.000000e+00> : vector<16x16xf32>
    %34 = tpu.matmul %31, %32, %cst_13 {dimension_numbers = #tpu.dot_dimension_numbers<[1], [1], [0], [0], [0, 0, 1, 0], [], []>} : vector<16x16xf32>, vector<16x16xf32>, vector<16x16xf32> -> vector<16x16xf32>
    %35 = arith.addf %34, %1 : vector<16x16xf32>
    %cst_14 = arith.constant dense<0xFF800000> : vector<16xf32>
    %36 = vector.multi_reduction <maximumf>, %35, %cst_14 [1] : vector<16x16xf32> to vector<16xf32>
    %37 = vector.shape_cast %36 : vector<16xf32> to vector<16x1xf32>
    %38 = vector.broadcast %37 : vector<16x1xf32> to vector<16x16xf32>
    %39 = arith.subf %35, %38 : vector<16x16xf32>
    %40 = math.exp %39 : vector<16x16xf32>
    %cst_15 = arith.constant dense<0.000000e+00> : vector<16xf32>
    %41 = vector.multi_reduction <add>, %40, %cst_15 [1] : vector<16x16xf32> to vector<16xf32>
    %42 = vector.shape_cast %41 : vector<16xf32> to vector<16x1xf32>
    %43 = tpu.reciprocal %42 : vector<16x1xf32> -> vector<16x1xf32>
    %44 = vector.broadcast %43 : vector<16x1xf32> to vector<16x16xf32>
    %45 = arith.mulf %40, %44 : vector<16x16xf32>
    %cst_16 = arith.constant dense<0.000000e+00> : vector<16x16xf32>
    %46 = tpu.matmul %45, %33, %cst_16 {dimension_numbers = #tpu.dot_dimension_numbers<[1], [0], [0], [1], [0, 0, 1, 1], [], []>} : vector<16x16xf32>, vector<16x16xf32>, vector<16x16xf32> -> vector<16x16xf32>
    %47 = vector.extract_strided_slice %30 {offsets = [0, 16], sizes = [16, 16], strides = [1, 1]} : vector<16x96xf32> to vector<16x16xf32>
    %48 = vector.extract_strided_slice %30 {offsets = [0, 48], sizes = [16, 16], strides = [1, 1]} : vector<16x96xf32> to vector<16x16xf32>
    %49 = vector.extract_strided_slice %30 {offsets = [0, 80], sizes = [16, 16], strides = [1, 1]} : vector<16x96xf32> to vector<16x16xf32>
    %cst_17 = arith.constant dense<0.000000e+00> : vector<16x16xf32>
    %50 = tpu.matmul %47, %48, %cst_17 {dimension_numbers = #tpu.dot_dimension_numbers<[1], [1], [0], [0], [0, 0, 1, 0], [], []>} : vector<16x16xf32>, vector<16x16xf32>, vector<16x16xf32> -> vector<16x16xf32>
    %51 = arith.addf %50, %1 : vector<16x16xf32>
    %cst_18 = arith.constant dense<0xFF800000> : vector<16xf32>
    %52 = vector.multi_reduction <maximumf>, %51, %cst_18 [1] : vector<16x16xf32> to vector<16xf32>
    %53 = vector.shape_cast %52 : vector<16xf32> to vector<16x1xf32>
    %54 = vector.broadcast %53 : vector<16x1xf32> to vector<16x16xf32>
    %55 = arith.subf %51, %54 : vector<16x16xf32>
    %56 = math.exp %55 : vector<16x16xf32>
    %cst_19 = arith.constant dense<0.000000e+00> : vector<16xf32>
    %57 = vector.multi_reduction <add>, %56, %cst_19 [1] : vector<16x16xf32> to vector<16xf32>
    %58 = vector.shape_cast %57 : vector<16xf32> to vector<16x1xf32>
    %59 = tpu.reciprocal %58 : vector<16x1xf32> -> vector<16x1xf32>
    %60 = vector.broadcast %59 : vector<16x1xf32> to vector<16x16xf32>
    %61 = arith.mulf %56, %60 : vector<16x16xf32>
    %cst_20 = arith.constant dense<0.000000e+00> : vector<16x16xf32>
    %62 = tpu.matmul %61, %49, %cst_20 {dimension_numbers = #tpu.dot_dimension_numbers<[1], [0], [0], [1], [0, 0, 1, 1], [], []>} : vector<16x16xf32>, vector<16x16xf32>, vector<16x16xf32> -> vector<16x16xf32>
    %63 = tpu.concatenate %46, %62 in 1 : vector<16x16xf32>, vector<16x16xf32> -> vector<16x32xf32>
    %c56 = arith.constant 56 : index
    %c0_21 = arith.constant 0 : index
    %64 = vector.load %arg2[%c56, %c0_21] : memref<400x128xf32, #tpu.memory_space<vmem>>, vector<32x32xf32>
    %c88 = arith.constant 88 : index
    %c0_22 = arith.constant 0 : index
    %65 = vector.load %arg2[%c88, %c0_22] : memref<400x128xf32, #tpu.memory_space<vmem>>, vector<1x32xf32>
    %cst_23 = arith.constant dense<0.000000e+00> : vector<16x32xf32>
    %66 = tpu.matmul %63, %64, %cst_23 {dimension_numbers = #tpu.dot_dimension_numbers<[1], [0], [0], [1], [0, 0, 1, 1], [], []>} : vector<16x32xf32>, vector<32x32xf32>, vector<16x32xf32> -> vector<16x32xf32>
    %67 = vector.broadcast %65 : vector<1x32xf32> to vector<16x32xf32>
    %68 = arith.addf %66, %67 : vector<16x32xf32>
    %69 = arith.addf %68, %25 : vector<16x32xf32>
    %c1 = arith.constant 1 : index
    %c0_24 = arith.constant 0 : index
    %70 = vector.load %arg2[%c1, %c0_24] : memref<400x128xf32, #tpu.memory_space<vmem>>, vector<1x32xf32>
    %c9 = arith.constant 9 : index
    %c0_25 = arith.constant 0 : index
    %71 = vector.load %arg2[%c9, %c0_25] : memref<400x128xf32, #tpu.memory_space<vmem>>, vector<1x32xf32>
    %cst_26 = arith.constant dense<0.000000e+00> : vector<16xf32>
    %72 = vector.multi_reduction <add>, %69, %cst_26 [1] : vector<16x32xf32> to vector<16xf32>
    %73 = vector.shape_cast %72 : vector<16xf32> to vector<16x1xf32>
    %cst_27 = arith.constant 3.200000e+01 : f32
    %74 = vector.broadcast %cst_27 : f32 to vector<16x1xf32>
    %75 = arith.divf %73, %74 : vector<16x1xf32>
    %76 = vector.broadcast %75 : vector<16x1xf32> to vector<16x32xf32>
    %77 = arith.subf %69, %76 : vector<16x32xf32>
    %78 = arith.mulf %77, %77 : vector<16x32xf32>
    %cst_28 = arith.constant dense<0.000000e+00> : vector<16xf32>
    %79 = vector.multi_reduction <add>, %78, %cst_28 [1] : vector<16x32xf32> to vector<16xf32>
    %80 = vector.shape_cast %79 : vector<16xf32> to vector<16x1xf32>
    %cst_29 = arith.constant 3.200000e+01 : f32
    %81 = vector.broadcast %cst_29 : f32 to vector<16x1xf32>
    %82 = arith.divf %80, %81 : vector<16x1xf32>
    %83 = vector.broadcast %75 : vector<16x1xf32> to vector<16x32xf32>
    %84 = arith.subf %69, %83 : vector<16x32xf32>
    %cst_30 = arith.constant 9.99999974E-6 : f32
    %85 = vector.broadcast %cst_30 : f32 to vector<16x1xf32>
    %86 = arith.addf %82, %85 : vector<16x1xf32>
    %87 = math.rsqrt %86 : vector<16x1xf32>
    %88 = vector.broadcast %87 : vector<16x1xf32> to vector<16x32xf32>
    %89 = arith.mulf %84, %88 : vector<16x32xf32>
    %90 = vector.broadcast %70 : vector<1x32xf32> to vector<16x32xf32>
    %91 = arith.mulf %89, %90 : vector<16x32xf32>
    %92 = vector.broadcast %71 : vector<1x32xf32> to vector<16x32xf32>
    %93 = arith.addf %91, %92 : vector<16x32xf32>
    %c96 = arith.constant 96 : index
    %c0_31 = arith.constant 0 : index
    %94 = vector.load %arg2[%c96, %c0_31] : memref<400x128xf32, #tpu.memory_space<vmem>>, vector<32x64xf32>
    %c128 = arith.constant 128 : index
    %c0_32 = arith.constant 0 : index
    %95 = vector.load %arg2[%c128, %c0_32] : memref<400x128xf32, #tpu.memory_space<vmem>>, vector<1x64xf32>
    %c136 = arith.constant 136 : index
    %c0_33 = arith.constant 0 : index
    %96 = vector.load %arg2[%c136, %c0_33] : memref<400x128xf32, #tpu.memory_space<vmem>>, vector<64x32xf32>
    %c200 = arith.constant 200 : index
    %c0_34 = arith.constant 0 : index
    %97 = vector.load %arg2[%c200, %c0_34] : memref<400x128xf32, #tpu.memory_space<vmem>>, vector<1x32xf32>
    %cst_35 = arith.constant dense<0.000000e+00> : vector<16x64xf32>
    %98 = tpu.matmul %93, %94, %cst_35 {dimension_numbers = #tpu.dot_dimension_numbers<[1], [0], [0], [1], [0, 0, 1, 1], [], []>} : vector<16x32xf32>, vector<32x64xf32>, vector<16x64xf32> -> vector<16x64xf32>
    %99 = vector.broadcast %95 : vector<1x64xf32> to vector<16x64xf32>
    %100 = arith.addf %98, %99 : vector<16x64xf32>
    %cst_36 = arith.constant 5.000000e-01 : f32
    %101 = vector.broadcast %cst_36 : f32 to vector<16x64xf32>
    %102 = arith.mulf %101, %100 : vector<16x64xf32>
    %cst_37 = arith.constant 0.707106769 : f32
    %103 = vector.broadcast %cst_37 : f32 to vector<16x64xf32>
    %104 = arith.mulf %100, %103 : vector<16x64xf32>
    %105 = math.erf %104 : vector<16x64xf32>
    %cst_38 = arith.constant 1.000000e+00 : f32
    %106 = vector.broadcast %cst_38 : f32 to vector<16x64xf32>
    %107 = arith.addf %106, %105 : vector<16x64xf32>
    %108 = arith.mulf %102, %107 : vector<16x64xf32>
    %cst_39 = arith.constant dense<0.000000e+00> : vector<16x32xf32>
    %109 = tpu.matmul %108, %96, %cst_39 {dimension_numbers = #tpu.dot_dimension_numbers<[1], [0], [0], [1], [0, 0, 1, 1], [], []>} : vector<16x64xf32>, vector<64x32xf32>, vector<16x32xf32> -> vector<16x32xf32>
    %110 = vector.broadcast %97 : vector<1x32xf32> to vector<16x32xf32>
    %111 = arith.addf %109, %110 : vector<16x32xf32>
    %112 = arith.addf %111, %93 : vector<16x32xf32>
    %c2 = arith.constant 2 : index
    %c0_40 = arith.constant 0 : index
    %113 = vector.load %arg2[%c2, %c0_40] : memref<400x128xf32, #tpu.memory_space<vmem>>, vector<1x32xf32>
    %c10 = arith.constant 10 : index
    %c0_41 = arith.constant 0 : index
    %114 = vector.load %arg2[%c10, %c0_41] : memref<400x128xf32, #tpu.memory_space<vmem>>, vector<1x32xf32>
    %cst_42 = arith.constant dense<0.000000e+00> : vector<16xf32>
    %115 = vector.multi_reduction <add>, %112, %cst_42 [1] : vector<16x32xf32> to vector<16xf32>
    %116 = vector.shape_cast %115 : vector<16xf32> to vector<16x1xf32>
    %cst_43 = arith.constant 3.200000e+01 : f32
    %117 = vector.broadcast %cst_43 : f32 to vector<16x1xf32>
    %118 = arith.divf %116, %117 : vector<16x1xf32>
    %119 = vector.broadcast %118 : vector<16x1xf32> to vector<16x32xf32>
    %120 = arith.subf %112, %119 : vector<16x32xf32>
    %121 = arith.mulf %120, %120 : vector<16x32xf32>
    %cst_44 = arith.constant dense<0.000000e+00> : vector<16xf32>
    %122 = vector.multi_reduction <add>, %121, %cst_44 [1] : vector<16x32xf32> to vector<16xf32>
    %123 = vector.shape_cast %122 : vector<16xf32> to vector<16x1xf32>
    %cst_45 = arith.constant 3.200000e+01 : f32
    %124 = vector.broadcast %cst_45 : f32 to vector<16x1xf32>
    %125 = arith.divf %123, %124 : vector<16x1xf32>
    %126 = vector.broadcast %118 : vector<16x1xf32> to vector<16x32xf32>
    %127 = arith.subf %112, %126 : vector<16x32xf32>
    %cst_46 = arith.constant 9.99999974E-6 : f32
    %128 = vector.broadcast %cst_46 : f32 to vector<16x1xf32>
    %129 = arith.addf %125, %128 : vector<16x1xf32>
    %130 = math.rsqrt %129 : vector<16x1xf32>
    %131 = vector.broadcast %130 : vector<16x1xf32> to vector<16x32xf32>
    %132 = arith.mulf %127, %131 : vector<16x32xf32>
    %133 = vector.broadcast %113 : vector<1x32xf32> to vector<16x32xf32>
    %134 = arith.mulf %132, %133 : vector<16x32xf32>
    %135 = vector.broadcast %114 : vector<1x32xf32> to vector<16x32xf32>
    %136 = arith.addf %134, %135 : vector<16x32xf32>
    %c208 = arith.constant 208 : index
    %c0_47 = arith.constant 0 : index
    %137 = vector.load %arg2[%c208, %c0_47] : memref<400x128xf32, #tpu.memory_space<vmem>>, vector<32x96xf32>
    %c240 = arith.constant 240 : index
    %c0_48 = arith.constant 0 : index
    %138 = vector.load %arg2[%c240, %c0_48] : memref<400x128xf32, #tpu.memory_space<vmem>>, vector<1x96xf32>
    %cst_49 = arith.constant dense<0.000000e+00> : vector<16x96xf32>
    %139 = tpu.matmul %136, %137, %cst_49 {dimension_numbers = #tpu.dot_dimension_numbers<[1], [0], [0], [1], [0, 0, 1, 1], [], []>} : vector<16x32xf32>, vector<32x96xf32>, vector<16x96xf32> -> vector<16x96xf32>
    %140 = vector.broadcast %138 : vector<1x96xf32> to vector<16x96xf32>
    %141 = arith.addf %139, %140 : vector<16x96xf32>
    %142 = vector.extract_strided_slice %141 {offsets = [0, 0], sizes = [16, 16], strides = [1, 1]} : vector<16x96xf32> to vector<16x16xf32>
    %143 = vector.extract_strided_slice %141 {offsets = [0, 32], sizes = [16, 16], strides = [1, 1]} : vector<16x96xf32> to vector<16x16xf32>
    %144 = vector.extract_strided_slice %141 {offsets = [0, 64], sizes = [16, 16], strides = [1, 1]} : vector<16x96xf32> to vector<16x16xf32>
    %cst_50 = arith.constant dense<0.000000e+00> : vector<16x16xf32>
    %145 = tpu.matmul %142, %143, %cst_50 {dimension_numbers = #tpu.dot_dimension_numbers<[1], [1], [0], [0], [0, 0, 1, 0], [], []>} : vector<16x16xf32>, vector<16x16xf32>, vector<16x16xf32> -> vector<16x16xf32>
    %146 = arith.addf %145, %1 : vector<16x16xf32>
    %cst_51 = arith.constant dense<0xFF800000> : vector<16xf32>
    %147 = vector.multi_reduction <maximumf>, %146, %cst_51 [1] : vector<16x16xf32> to vector<16xf32>
    %148 = vector.shape_cast %147 : vector<16xf32> to vector<16x1xf32>
    %149 = vector.broadcast %148 : vector<16x1xf32> to vector<16x16xf32>
    %150 = arith.subf %146, %149 : vector<16x16xf32>
    %151 = math.exp %150 : vector<16x16xf32>
    %cst_52 = arith.constant dense<0.000000e+00> : vector<16xf32>
    %152 = vector.multi_reduction <add>, %151, %cst_52 [1] : vector<16x16xf32> to vector<16xf32>
    %153 = vector.shape_cast %152 : vector<16xf32> to vector<16x1xf32>
    %154 = tpu.reciprocal %153 : vector<16x1xf32> -> vector<16x1xf32>
    %155 = vector.broadcast %154 : vector<16x1xf32> to vector<16x16xf32>
    %156 = arith.mulf %151, %155 : vector<16x16xf32>
    %cst_53 = arith.constant dense<0.000000e+00> : vector<16x16xf32>
    %157 = tpu.matmul %156, %144, %cst_53 {dimension_numbers = #tpu.dot_dimension_numbers<[1], [0], [0], [1], [0, 0, 1, 1], [], []>} : vector<16x16xf32>, vector<16x16xf32>, vector<16x16xf32> -> vector<16x16xf32>
    %158 = vector.extract_strided_slice %141 {offsets = [0, 16], sizes = [16, 16], strides = [1, 1]} : vector<16x96xf32> to vector<16x16xf32>
    %159 = vector.extract_strided_slice %141 {offsets = [0, 48], sizes = [16, 16], strides = [1, 1]} : vector<16x96xf32> to vector<16x16xf32>
    %160 = vector.extract_strided_slice %141 {offsets = [0, 80], sizes = [16, 16], strides = [1, 1]} : vector<16x96xf32> to vector<16x16xf32>
    %cst_54 = arith.constant dense<0.000000e+00> : vector<16x16xf32>
    %161 = tpu.matmul %158, %159, %cst_54 {dimension_numbers = #tpu.dot_dimension_numbers<[1], [1], [0], [0], [0, 0, 1, 0], [], []>} : vector<16x16xf32>, vector<16x16xf32>, vector<16x16xf32> -> vector<16x16xf32>
    %162 = arith.addf %161, %1 : vector<16x16xf32>
    %cst_55 = arith.constant dense<0xFF800000> : vector<16xf32>
    %163 = vector.multi_reduction <maximumf>, %162, %cst_55 [1] : vector<16x16xf32> to vector<16xf32>
    %164 = vector.shape_cast %163 : vector<16xf32> to vector<16x1xf32>
    %165 = vector.broadcast %164 : vector<16x1xf32> to vector<16x16xf32>
    %166 = arith.subf %162, %165 : vector<16x16xf32>
    %167 = math.exp %166 : vector<16x16xf32>
    %cst_56 = arith.constant dense<0.000000e+00> : vector<16xf32>
    %168 = vector.multi_reduction <add>, %167, %cst_56 [1] : vector<16x16xf32> to vector<16xf32>
    %169 = vector.shape_cast %168 : vector<16xf32> to vector<16x1xf32>
    %170 = tpu.reciprocal %169 : vector<16x1xf32> -> vector<16x1xf32>
    %171 = vector.broadcast %170 : vector<16x1xf32> to vector<16x16xf32>
    %172 = arith.mulf %167, %171 : vector<16x16xf32>
    %cst_57 = arith.constant dense<0.000000e+00> : vector<16x16xf32>
    %173 = tpu.matmul %172, %160, %cst_57 {dimension_numbers = #tpu.dot_dimension_numbers<[1], [0], [0], [1], [0, 0, 1, 1], [], []>} : vector<16x16xf32>, vector<16x16xf32>, vector<16x16xf32> -> vector<16x16xf32>
    %174 = tpu.concatenate %157, %173 in 1 : vector<16x16xf32>, vector<16x16xf32> -> vector<16x32xf32>
    %c248 = arith.constant 248 : index
    %c0_58 = arith.constant 0 : index
    %175 = vector.load %arg2[%c248, %c0_58] : memref<400x128xf32, #tpu.memory_space<vmem>>, vector<32x32xf32>
    %c280 = arith.constant 280 : index
    %c0_59 = arith.constant 0 : index
    %176 = vector.load %arg2[%c280, %c0_59] : memref<400x128xf32, #tpu.memory_space<vmem>>, vector<1x32xf32>
    %cst_60 = arith.constant dense<0.000000e+00> : vector<16x32xf32>
    %177 = tpu.matmul %174, %175, %cst_60 {dimension_numbers = #tpu.dot_dimension_numbers<[1], [0], [0], [1], [0, 0, 1, 1], [], []>} : vector<16x32xf32>, vector<32x32xf32>, vector<16x32xf32> -> vector<16x32xf32>
    %178 = vector.broadcast %176 : vector<1x32xf32> to vector<16x32xf32>
    %179 = arith.addf %177, %178 : vector<16x32xf32>
    %180 = arith.addf %179, %136 : vector<16x32xf32>
    %c3 = arith.constant 3 : index
    %c0_61 = arith.constant 0 : index
    %181 = vector.load %arg2[%c3, %c0_61] : memref<400x128xf32, #tpu.memory_space<vmem>>, vector<1x32xf32>
    %c11 = arith.constant 11 : index
    %c0_62 = arith.constant 0 : index
    %182 = vector.load %arg2[%c11, %c0_62] : memref<400x128xf32, #tpu.memory_space<vmem>>, vector<1x32xf32>
    %cst_63 = arith.constant dense<0.000000e+00> : vector<16xf32>
    %183 = vector.multi_reduction <add>, %180, %cst_63 [1] : vector<16x32xf32> to vector<16xf32>
    %184 = vector.shape_cast %183 : vector<16xf32> to vector<16x1xf32>
    %cst_64 = arith.constant 3.200000e+01 : f32
    %185 = vector.broadcast %cst_64 : f32 to vector<16x1xf32>
    %186 = arith.divf %184, %185 : vector<16x1xf32>
    %187 = vector.broadcast %186 : vector<16x1xf32> to vector<16x32xf32>
    %188 = arith.subf %180, %187 : vector<16x32xf32>
    %189 = arith.mulf %188, %188 : vector<16x32xf32>
    %cst_65 = arith.constant dense<0.000000e+00> : vector<16xf32>
    %190 = vector.multi_reduction <add>, %189, %cst_65 [1] : vector<16x32xf32> to vector<16xf32>
    %191 = vector.shape_cast %190 : vector<16xf32> to vector<16x1xf32>
    %cst_66 = arith.constant 3.200000e+01 : f32
    %192 = vector.broadcast %cst_66 : f32 to vector<16x1xf32>
    %193 = arith.divf %191, %192 : vector<16x1xf32>
    %194 = vector.broadcast %186 : vector<16x1xf32> to vector<16x32xf32>
    %195 = arith.subf %180, %194 : vector<16x32xf32>
    %cst_67 = arith.constant 9.99999974E-6 : f32
    %196 = vector.broadcast %cst_67 : f32 to vector<16x1xf32>
    %197 = arith.addf %193, %196 : vector<16x1xf32>
    %198 = math.rsqrt %197 : vector<16x1xf32>
    %199 = vector.broadcast %198 : vector<16x1xf32> to vector<16x32xf32>
    %200 = arith.mulf %195, %199 : vector<16x32xf32>
    %201 = vector.broadcast %181 : vector<1x32xf32> to vector<16x32xf32>
    %202 = arith.mulf %200, %201 : vector<16x32xf32>
    %203 = vector.broadcast %182 : vector<1x32xf32> to vector<16x32xf32>
    %204 = arith.addf %202, %203 : vector<16x32xf32>
    %c288 = arith.constant 288 : index
    %c0_68 = arith.constant 0 : index
    %205 = vector.load %arg2[%c288, %c0_68] : memref<400x128xf32, #tpu.memory_space<vmem>>, vector<32x64xf32>
    %c320 = arith.constant 320 : index
    %c0_69 = arith.constant 0 : index
    %206 = vector.load %arg2[%c320, %c0_69] : memref<400x128xf32, #tpu.memory_space<vmem>>, vector<1x64xf32>
    %c328 = arith.constant 328 : index
    %c0_70 = arith.constant 0 : index
    %207 = vector.load %arg2[%c328, %c0_70] : memref<400x128xf32, #tpu.memory_space<vmem>>, vector<64x32xf32>
    %c392 = arith.constant 392 : index
    %c0_71 = arith.constant 0 : index
    %208 = vector.load %arg2[%c392, %c0_71] : memref<400x128xf32, #tpu.memory_space<vmem>>, vector<1x32xf32>
    %cst_72 = arith.constant dense<0.000000e+00> : vector<16x64xf32>
    %209 = tpu.matmul %204, %205, %cst_72 {dimension_numbers = #tpu.dot_dimension_numbers<[1], [0], [0], [1], [0, 0, 1, 1], [], []>} : vector<16x32xf32>, vector<32x64xf32>, vector<16x64xf32> -> vector<16x64xf32>
    %210 = vector.broadcast %206 : vector<1x64xf32> to vector<16x64xf32>
    %211 = arith.addf %209, %210 : vector<16x64xf32>
    %cst_73 = arith.constant 5.000000e-01 : f32
    %212 = vector.broadcast %cst_73 : f32 to vector<16x64xf32>
    %213 = arith.mulf %212, %211 : vector<16x64xf32>
    %cst_74 = arith.constant 0.707106769 : f32
    %214 = vector.broadcast %cst_74 : f32 to vector<16x64xf32>
    %215 = arith.mulf %211, %214 : vector<16x64xf32>
    %216 = math.erf %215 : vector<16x64xf32>
    %cst_75 = arith.constant 1.000000e+00 : f32
    %217 = vector.broadcast %cst_75 : f32 to vector<16x64xf32>
    %218 = arith.addf %217, %216 : vector<16x64xf32>
    %219 = arith.mulf %213, %218 : vector<16x64xf32>
    %cst_76 = arith.constant dense<0.000000e+00> : vector<16x32xf32>
    %220 = tpu.matmul %219, %207, %cst_76 {dimension_numbers = #tpu.dot_dimension_numbers<[1], [0], [0], [1], [0, 0, 1, 1], [], []>} : vector<16x64xf32>, vector<64x32xf32>, vector<16x32xf32> -> vector<16x32xf32>
    %221 = vector.broadcast %208 : vector<1x32xf32> to vector<16x32xf32>
    %222 = arith.addf %220, %221 : vector<16x32xf32>
    %223 = arith.addf %222, %204 : vector<16x32xf32>
    %c4 = arith.constant 4 : index
    %c0_77 = arith.constant 0 : index
    %224 = vector.load %arg2[%c4, %c0_77] : memref<400x128xf32, #tpu.memory_space<vmem>>, vector<1x32xf32>
    %c12 = arith.constant 12 : index
    %c0_78 = arith.constant 0 : index
    %225 = vector.load %arg2[%c12, %c0_78] : memref<400x128xf32, #tpu.memory_space<vmem>>, vector<1x32xf32>
    %cst_79 = arith.constant dense<0.000000e+00> : vector<16xf32>
    %226 = vector.multi_reduction <add>, %223, %cst_79 [1] : vector<16x32xf32> to vector<16xf32>
    %227 = vector.shape_cast %226 : vector<16xf32> to vector<16x1xf32>
    %cst_80 = arith.constant 3.200000e+01 : f32
    %228 = vector.broadcast %cst_80 : f32 to vector<16x1xf32>
    %229 = arith.divf %227, %228 : vector<16x1xf32>
    %230 = vector.broadcast %229 : vector<16x1xf32> to vector<16x32xf32>
    %231 = arith.subf %223, %230 : vector<16x32xf32>
    %232 = arith.mulf %231, %231 : vector<16x32xf32>
    %cst_81 = arith.constant dense<0.000000e+00> : vector<16xf32>
    %233 = vector.multi_reduction <add>, %232, %cst_81 [1] : vector<16x32xf32> to vector<16xf32>
    %234 = vector.shape_cast %233 : vector<16xf32> to vector<16x1xf32>
    %cst_82 = arith.constant 3.200000e+01 : f32
    %235 = vector.broadcast %cst_82 : f32 to vector<16x1xf32>
    %236 = arith.divf %234, %235 : vector<16x1xf32>
    %237 = vector.broadcast %229 : vector<16x1xf32> to vector<16x32xf32>
    %238 = arith.subf %223, %237 : vector<16x32xf32>
    %cst_83 = arith.constant 9.99999974E-6 : f32
    %239 = vector.broadcast %cst_83 : f32 to vector<16x1xf32>
    %240 = arith.addf %236, %239 : vector<16x1xf32>
    %241 = math.rsqrt %240 : vector<16x1xf32>
    %242 = vector.broadcast %241 : vector<16x1xf32> to vector<16x32xf32>
    %243 = arith.mulf %238, %242 : vector<16x32xf32>
    %244 = vector.broadcast %224 : vector<1x32xf32> to vector<16x32xf32>
    %245 = arith.mulf %243, %244 : vector<16x32xf32>
    %246 = vector.broadcast %225 : vector<1x32xf32> to vector<16x32xf32>
    %247 = arith.addf %245, %246 : vector<16x32xf32>
    %c0_84 = arith.constant 0 : index
    %c0_85 = arith.constant 0 : index
    %248 = vector.load %arg3[%c0_84, %c0_85] : memref<16x32xf32, #tpu.memory_space<vmem>>, vector<16x32xf32>
    tpu.vector_store %arg3[%c0_84, %c0_85], %247 {strides = array<i32>} : memref<16x32xf32, #tpu.memory_space<vmem>>, vector<16x32xf32>,
    return
  }
}

</mosaic_0001>

<bundles_post_ra>
// kernel: xlm_r_forward.1
= control target key start
LH: loop header
LB: loop body
LE: loop exit
PB: predicated region body
PF: predicated region fallthrough
CT: control target
= control target key end

     0   :  { %vm21_vm0 = vcmask 261120   ;;  %s2751_s0 = inlined_call_operand.vmem [shape: f32[16,32], index: 0, kind: input, shape index: {}]   ;;  %s2752_s1 = inlined_call_operand.vmem [shape: f32[16,16], index: 1, kind: input, shape index: {}]   ;;  %s2753_s2 = inlined_call_operand.vmem [shape: f32[400,128], index: 2, kind: input, shape index: {}]   ;;  %s2754_s3 = inlined_call_operand.hbm [shape: f32[16,32], index: 3, kind: output, shape index: {}]  }
   0x1   :  { %v15_v0 = vld [vmem:[%s2751_s0] sm:$0xff]  ;;  %v16_v1 = vld [vmem:[%s2751_s0 + $0x8] sm:$0xff] }
   0x2   :  { %8 = vsyncpa [#allocation3], 0  ;;  %v22_v2 = vsel %vm21_vm0, %v15_v0, 0.0  ;;  %v25_v3 = vsel %vm21_vm0, %v16_v1, 0.0  ;;  %v61_v14 = vld [vmem:[%s2753_s2 + $0x10] sm:$0xff]  ;;  %v62_v15 = vld [vmem:[%s2753_s2 + $0x18] sm:$0xff] }
   0x3   :  { %23 = vadd.xlane.f32.xlu0 %v22_v2  ;;  %v63_v16 = vld [vmem:[%s2753_s2 + $0x20] sm:$0xff]  ;;  %v2119_v17 = vpack.c.bf16 %v62_v15, %v61_v14  ;;  %v64_v18 = vld [vmem:[%s2753_s2 + $0x28] sm:$0xff]  ;;  %v1815_v36 = vld [vmem:[%s2753_s2 + $0x30] ss:$0 sm:$0xff]  ;;  %vm157_vm1 = vcmask 130048   ;;  %s2372_s29 = smov 80  }
   0x4   :  { %v2123_v19 = vpack.c.bf16 %v64_v18, %v63_v16  ;;  %v1813_v27 = vld [vmem:[%s2753_s2] ss:$0 sm:$0xff]  ;;  %v1814_v29 = vld [vmem:[%s2753_s2 + $0x8] ss:$0 sm:$0xff]  ;;  %s2373_s30 = smov 96   ;;  %s2374_s4 = smov 112   ;;  %vm2451_vm2 = vmpackc.low %vm157_vm1, %vm157_vm1 }
   0x5   :  { %2120 = vmatprep.subr.bf16.mxu1 %v2119_v17  ;;  %v2469_v53 = vld [vmem:[%s2752_s1 + $0x8] sm:$0xff]  ;;  %v2474_v54 = vld [vmem:[%s2752_s1] sm:$0xff]  ;;  %s2375_s1 = smov 48   ;;  %s2376_s9 = smov 64   ;;  %vm805_vm3 = vcmask 523264  }
   0x6   :  { %2122 = vmatpush3.bf16.msra.mxu1 %v2119_v17  ;;  %s2377_s17 = smov 16   ;;  %s2378_s7 = smov [#allocation2]  }
   0x7   :  { %26 = vadd.xlane.f32.xlu0 %v25_v3  ;;  %2124 = vmatprep.subr.bf16.mxu1 %v2123_v19  ;;  %s1802_s8 = sshll.u32 %s2378_s7, 4  ;;  %s1803_s8 = int_to_ptr.vmem [resolvable:$true] %s1802_s8 }
   0x8   :  { %s2348_s10 = scalar_lea.vmem %s1803_s8, 256  ;;  %p2353_p1 = scmp.lt.s32.totalorder %s1803_s8, %s1803_s8 }
   0x9   :  { %p2349_p0 = scmp.ne.s32.totalorder %s1803_s8, %s2348_s10  ;;  %p2354_p2 = scmp.lt.s32.totalorder %s2348_s10, %s2348_s10 }
   0xa   :  { %2126 = vmatpush3.bf16.msra.mxu1 %v2123_v19 }
   0xb   :  { %p2355_p3 = por %p2354_p2, %p2353_p1 }
   0xd   :  { %p2356_p4 = pnand %p2355_p3, %p2349_p0 }
  0x90   :  { %v24_v4 = vpop.xlane.xlu0 %23 }
  0x91   :  { %v29_v5 = vmul.f32 0.03125, %v24_v4 }
  0x93   :  { %v31_v6 = vsub.f32 %v15_v0, %v29_v5 }
  0x94   :  { %v27_v7 = vpop.xlane.xlu0 %26 }
  0x95   :  { %v30_v8 = vmul.f32 0.03125, %v27_v7  ;;  %v33_v9 = vmul.f32 %v31_v6, %v31_v6 }
  0x97   :  { %v32_v10 = vsub.f32 %v16_v1, %v30_v8  ;;  %v35_v11 = vsel %vm21_vm0, %v33_v9, 0.0 }
  0x98   :  { %36 = vadd.xlane.f32.xlu1 %v35_v11 }
  0x99   :  { %v34_v12 = vmul.f32 %v32_v10, %v32_v10 }
  0x9b   :  { %v38_v13 = vsel %vm21_vm0, %v34_v12, 0.0 }
  0x9c   :  { %39 = vadd.xlane.f32.xlu1 %v38_v13 }
 0x125   :  { %v37_v20 = vpop.xlane.xlu1 %36 }
 0x126   :  { %v41_v21 = vmul.f32 0.03125, %v37_v20 }
 0x128   :  { %v43_v22 = vadd.f32 1e-05, %v41_v21 }
 0x129   :  { %v40_v23 = vpop.xlane.xlu1 %39 }
 0x12a   :  { %2288 = vrsqrt.f32 %v43_v22  ;;  %v42_v24 = vmul.f32 0.03125, %v40_v23 }
 0x12c   :  { %v44_v25 = vadd.f32 1e-05, %v42_v24 }
 0x12e   :  { %2290 = vrsqrt.f32 %v44_v25 }
 0x134   :  { %v2289_v26 = vpop.eup %2288 }
 0x135   :  { %v47_v28 = vmul.f32 %v2289_v26, %v31_v6 }
 0x137   :  { %v53_v30 = vmul.f32 %v1813_v27, %v47_v28 }
 0x138   :  { %v2291_v31 = vpop.eup %2290 }
 0x139   :  { %v48_v32 = vmul.f32 %v2291_v31, %v32_v10  ;;  %v2429_v33 = vadd.f32 %v1814_v29, %v53_v30 }
 0x13b   :  { %v54_v34 = vmul.f32 %v1813_v27, %v48_v32  ;;  %1967 = vmatprep.mubr.msk.f32.mxu1 %vm21_vm0, %v2429_v33 }
 0x13d   :  { %v2433_v35 = vadd.f32 %v1814_v29, %v54_v34 }
 0x13f   :  { %1968 = vmatmul.mubr.msk.f32.vlgmr.msra.gmra.mrb[0].mxu1 %vm21_vm0, %v2433_v35 }
 0x212   :  { %v1969_v37 = vpop.f32.mrb[0].mxu1 }
 0x213   :  { %v148_v38 = vadd.f32 %v1969_v37, %v1815_v36  ;;  %v142_v39 = vpop.f32.mrb[1].mxu1 }
 0x214   :  { %v143_v40 = vadd.f32 %v1815_v36, %v142_v39 }
 0x216   :  { %1974 = vmatprep.mubr.msk.f32.mxu1 %vm157_vm1, %v143_v40  ;;  %v2441_v41 = vpack.i.bf16 %v148_v38, %v143_v40 }
 0x218   :  { %2254 = vrot.lane.b32.xlu1 %v2441_v41, %s2372_s29  ;;  %2249 = vrot.lane.b32.xlu0 %v2441_v41, %s2373_s30 }
 0x21c   :  { %350 = vrot.lane.b32.xlu1 %v143_v40, %s2374_s4 }
 0x220   :  { %352 = vrot.lane.b32.xlu1 %v148_v38, %s2374_s4 }
 0x28a   :  { %v2255_v42 = vpop.permute.xlu1 %2254  ;;  %v2250_v43 = vpop.permute.xlu0 %2249 }
 0x28b   :  { %v2257_v44 = vunpack.i.h.bf16 %v2255_v42  ;;  %v2256_v45 = vunpack.i.l.bf16 %v2255_v42  ;;  %v2252_v46 = vunpack.i.h.bf16 %v2250_v43  ;;  %v2251_v47 = vunpack.i.l.bf16 %v2250_v43 }
 0x28d   :  { %v2127_v49 = vpack.c.bf16 %v2252_v46, %v2251_v47  ;;  %v2137_v50 = vpack.c.bf16 %v2257_v44, %v2256_v45  ;;  %v560_v45 = vld [vmem:[%s2753_s2 + $0x38] sm:$0xff]  ;;  %v561_v46 = vld [vmem:[%s2753_s2 + $0x40] sm:$0xff] }
 0x28e   :  { %v351_v51 = vpop.permute.xlu1 %350  ;;  %v2147_v47 = vpack.c.bf16 %v561_v46, %v560_v45  ;;  %v701_v45 = vld [vmem:[%s2753_s2 + $0xa8] sm:$0xff]  ;;  %v702_v46 = vld [vmem:[%s2753_s2 + $0xb0] sm:$0xff] }
 0x28f   :  { %2129 = vmatprep.subr.msk.bf16.mxu1 %vm2451_vm2, %v2127_v49 }
 0x290   :  { %2132 = vmatpush3.bf16.xpose.msk.msra.mxu1 %vm2451_vm2, %v2127_v49  ;;  %v562_v49 = vld [vmem:[%s2753_s2 + $0x48] sm:$0xff] }
 0x291   :  { %2139 = vmatprep.subr.msk.bf16.mxu1 %vm2451_vm2, %v2137_v50 }
 0x292   :  { %v353_v52 = vpop.permute.xlu1 %352 }
 0x297   :  { %1975 = vmatmul.mubr.msk.f32.vlgmr.msra.gmra.mrb[2].mxu1 %vm157_vm1, %v148_v38 }
 0x298   :  { %2142 = vmatpush3.bf16.xpose.msk.msra.mxu1 %vm2451_vm2, %v2137_v50  ;;  %1988 = vmatprep.mubr.msk.f32.mxu1 %vm157_vm1, %v351_v51  ;;  %v563_v50 = vld [vmem:[%s2753_s2 + $0x50] sm:$0xff] }
 0x299   :  { %v2151_v51 = vpack.c.bf16 %v563_v50, %v562_v49  ;;  %v703_v49 = vld [vmem:[%s2753_s2 + $0xb8] sm:$0xff]  ;;  %v704_v50 = vld [vmem:[%s2753_s2 + $0xc0] sm:$0xff] }
 0x29f   :  { %1989 = vmatmul.mubr.msk.f32.vlgmr.msra.gmra.mrb[4].mxu1 %vm157_vm1, %v353_v52 }
 0x36a   :  { %v1976_v55 = vpop.f32.mrb[2].mxu1 }
 0x36b   :  { %v238_v56 = vadd.f32 %v1976_v55, %v2469_v53  ;;  %v232_v57 = vpop.f32.mrb[3].mxu1 }
 0x36c   :  { %v233_v58 = vadd.f32 %v232_v57, %v2474_v54 }
 0x36d   :  { %v244_v59 = vsel %vm157_vm1, %v238_v56, -inf }
 0x36e   :  { %245 = vmax.xlane.f32.xlu1 %v244_v59  ;;  %v241_v60 = vsel %vm157_vm1, %v233_v58, -inf }
 0x36f   :  { %242 = vmax.xlane.f32.xlu0 %v241_v60 }
 0x372   :  { %v1990_v61 = vpop.f32.mrb[4].mxu1 }
 0x373   :  { %v432_v62 = vpop.f32.mrb[5].mxu1  ;;  %v438_v0 = vadd.f32 %v1990_v61, %v2469_v53 }
 0x374   :  { %v433_v63 = vadd.f32 %v432_v62, %v2474_v54  ;;  %v1830_v62 = vld [vmem:[%s2753_s2 + $0x58] ss:$0 sm:$0xff] }
 0x375   :  { %v444_v2 = vsel %vm157_vm1, %v438_v0, -inf }
 0x376   :  { %v441_v1 = vsel %vm157_vm1, %v433_v63, -inf }
 0x377   :  { %442 = vmax.xlane.f32.xlu0 %v441_v1 }
 0x37b   :  { %445 = vmax.xlane.f32.xlu0 %v444_v2 }
 0x3fb   :  { %v246_v3 = vpop.xlane.xlu1 %245 }
 0x3fc   :  { %v248_v4 = vsub.f32 %v238_v56, %v246_v3  ;;  %v243_v5 = vpop.xlane.xlu0 %242 }
 0x3fd   :  { %v247_v6 = vsub.f32 %v233_v58, %v243_v5 }
 0x3fe   :  { %v251_v7 = vmul.f32 1.442695, %v248_v4 }
 0x3ff   :  { %v249_v8 = vmul.f32 1.442695, %v247_v6 }
 0x400   :  { %2292 = vpow2.f32 %v251_v7 }
 0x401   :  { %2294 = vpow2.f32 %v249_v8 }
 0x404   :  { %v443_v9 = vpop.xlane.xlu0 %442 }
 0x405   :  { %v447_v10 = vsub.f32 %v433_v63, %v443_v9 }
 0x407   :  { %v449_v11 = vmul.f32 1.442695, %v447_v10 }
 0x408   :  { %v446_v12 = vpop.xlane.xlu0 %445 }
 0x409   :  { %2296 = vpow2.f32 %v449_v11  ;;  %v448_v13 = vsub.f32 %v438_v0, %v446_v12 }
 0x40a   :  { %v2293_v14 = vpop.eup %2292 }
 0x40b   :  { %v2295_v15 = vpop.eup %2294  ;;  %v451_v16 = vmul.f32 1.442695, %v448_v13  ;;  %v256_v17 = vsel %vm157_vm1, %v2293_v14, 0.0 }
 0x40c   :  { %257 = vadd.xlane.f32.xlu1 %v256_v17  ;;  %v253_v18 = vsel %vm157_vm1, %v2295_v15, 0.0 }
 0x40d   :  { %2298 = vpow2.f32 %v451_v16  ;;  %254 = vadd.xlane.f32.xlu0 %v253_v18  ;;  %v693_v16 = vld [vmem:[%s2753_s2 + $0x68] sm:$0xff]  ;;  %v694_v18 = vld [vmem:[%s2753_s2 + $0x70] sm:$0xff] }
 0x413   :  { %v2297_v19 = vpop.eup %2296 }
 0x414   :  { %v453_v20 = vsel %vm157_vm1, %v2297_v19, 0.0 }
 0x415   :  { %454 = vadd.xlane.f32.xlu0 %v453_v20 }
 0x417   :  { %v2299_v21 = vpop.eup %2298 }
 0x418   :  { %v456_v22 = vsel %vm157_vm1, %v2299_v21, 0.0 }
 0x419   :  { %457 = vadd.xlane.f32.xlu1 %v456_v22 }
 0x42a   :  { %2264 = vrot.lane.b32.xlu1 %v2441_v41, %s2375_s1 }
 0x42b   :  { %2259 = vrot.lane.b32.xlu0 %v2441_v41, %s2376_s9 }
 0x499   :  { %v258_v24 = vpop.xlane.xlu1 %257 }
 0x49a   :  { %v255_v23 = vpop.xlane.xlu0 %254 }
 0x49b   :  { %2300 = vrcp.f32 %v255_v23 }
 0x49c   :  { %2302 = vrcp.f32 %v258_v24 }
 0x4a2   :  { %v455_v25 = vpop.xlane.xlu0 %454 }
 0x4a3   :  { %2304 = vrcp.f32 %v455_v25 }
 0x4a5   :  { %v2301_v26 = vpop.eup %2300 }
 0x4a6   :  { %v458_v27 = vpop.xlane.xlu1 %457  ;;  %v2260_v28 = vpop.permute.xlu0 %2259  ;;  %v261_v29 = vmul.f32 %v2301_v26, %v2295_v15 }
 0x4a7   :  { %2306 = vrcp.f32 %v458_v27  ;;  %v2262_v30 = vunpack.i.h.bf16 %v2260_v28  ;;  %v2261_v31 = vunpack.i.l.bf16 %v2260_v28  ;;  %v2303_v34 = vpop.eup %2302  ;;  %v1833_v28 = vld [vmem:[%s2753_s2 + $0x1] ss:$0 sm:$0xff] }
 0x4a8   :  { %1981 = vmatprep.mubr.msk.f32.mxu0 %vm157_vm1, %v261_v29  ;;  %v262_v41 = vmul.f32 %v2303_v34, %v2293_v14 }
 0x4a9   :  { %v2133_v32 = vpack.c.bf16 %v2262_v30, %v2261_v31  ;;  %v1834_v30 = vld [vmem:[%s2753_s2 + $0x9] ss:$0 sm:$0xff] }
 0x4aa   :  { %v2265_v36 = vpop.permute.xlu1 %2264 }
 0x4ab   :  { %v2267_v37 = vunpack.i.h.bf16 %v2265_v36  ;;  %v2266_v38 = vunpack.i.l.bf16 %v2265_v36  ;;  %2134 = vmatprep.subr.bf16.mxu0 %v2133_v32 }
 0x4ac   :  { %2136 = vmatpush3.bf16.msra.mxu0 %v2133_v32 }
 0x4ad   :  { %v2305_v39 = vpop.eup %2304  ;;  %v2143_v40 = vpack.c.bf16 %v2267_v37, %v2266_v38 }
 0x4ae   :  { %v461_v42 = vmul.f32 %v2305_v39, %v2297_v19  ;;  %v695_v19 = vld [vmem:[%s2753_s2 + $0x78] sm:$0xff]  ;;  %v697_v39 = vld [vmem:[%s2753_s2 + $0x88] sm:$0xff] }
 0x4af   :  { %1982 = vmatmul.mubr.msk.f32.vlgmr.msra.gmra.mrb[0].mxu0 %vm157_vm1, %v262_v41  ;;  %2144 = vmatprep.subr.bf16.mxu0 %v2143_v40  ;;  %v2159_v20 = vpack.c.bf16 %v695_v19, %v694_v18 }
 0x4b0   :  { %2146 = vmatpush3.bf16.msra.mxu0 %v2143_v40  ;;  %1995 = vmatprep.mubr.msk.f32.mxu0 %vm157_vm1, %v461_v42  ;;  %v698_v40 = vld [vmem:[%s2753_s2 + $0x90] sm:$0xff]  ;;  %v699_v42 = vld [vmem:[%s2753_s2 + $0x98] sm:$0xff] }
 0x4b1   :  { %v2307_v43 = vpop.eup %2306  ;;  %2148 = vmatprep.subr.bf16.mxu0 %v2147_v47  ;;  %v2163_v41 = vpack.c.bf16 %v698_v40, %v697_v39 }
 0x4b2   :  { %v462_v44 = vmul.f32 %v2307_v43, %v2299_v21  ;;  %v700_v43 = vld [vmem:[%s2753_s2 + $0xa0] sm:$0xff] }
 0x4b4   :  { %1996 = vmatmul.mubr.msk.f32.vlgmr.msra.gmra.mrb[2].mxu0 %vm157_vm1, %v462_v44  ;;  %v2167_v44 = vpack.c.bf16 %v700_v43, %v699_v42 }
 0x4b5   :  { %2150 = vmatpush3.bf16.msra.mxu0 %v2147_v47  ;;  %v2171_v47 = vpack.c.bf16 %v702_v46, %v701_v45  ;;  %v1843_v46 = vld [vmem:[%s2753_s2 + $0xf0] ss:$0 sm:$0xff] }
 0x4b6   :  { %2152 = vmatprep.subr.bf16.mxu0 %v2151_v51 }
 0x4b9   :  { %2154 = vmatpush3.bf16.msra.mxu0 %v2151_v51  ;;  %v2175_v51 = vpack.c.bf16 %v704_v50, %v703_v49 }
 0x4ba   :  { %2164 = vmatprep.subr.bf16.mxu0 %v2163_v41 }
 0x582   :  { %v1983_v52 = vpop.f32.mrb[0].mxu0 }
 0x583   :  { %v341_v55 = vpop.f32.mrb[1].mxu0 }
 0x587   :  { %v1997_v56 = vpop.f32.mrb[2].mxu0 }
 0x588   :  { %v541_v57 = vpop.f32.mrb[3].mxu0 }
 0x589   :  { %552 = vrot.lane.b32.xlu1 %v541_v57, %s2377_s17 }
 0x58d   :  { %554 = vrot.lane.b32.xlu1 %v1997_v56, %s2377_s17 }
 0x5fb   :  { %v553_v58 = vpop.permute.xlu1 %552 }
 0x5fc   :  { %v558_v59 = vsel %vm157_vm1, %v341_v55, %v553_v58 }
 0x5fd   :  { %2006 = vmatprep.mubr.msk.f32.mxu0 %vm21_vm0, %v558_v59 }
 0x5ff   :  { %v555_v60 = vpop.permute.xlu1 %554 }
 0x600   :  { %v559_v61 = vsel %vm157_vm1, %v1983_v52, %v555_v60  ;;  %v1835_v52 = vld [vmem:[%s2753_s2 + $0x80] ss:$0 sm:$0xff] }
 0x601   :  { %2007 = vmatmul.mubr.msk.f32.vlgmr.msra.gmra.mrb[4].mxu0 %vm21_vm0, %v559_v61 }
 0x602   :  { %2166 = vmatpush3.bf16.msra.mxu0 %v2163_v41  ;;  %v1842_v41 = vld [vmem:[%s2753_s2 + $0xa] ss:$0 sm:$0xff] }
 0x603   :  { %2168 = vmatprep.subr.bf16.mxu0 %v2167_v44 }
 0x606   :  { %2170 = vmatpush3.bf16.msra.mxu0 %v2167_v44 }
 0x607   :  { %2172 = vmatprep.subr.bf16.mxu0 %v2171_v47 }
 0x60a   :  { %2174 = vmatpush3.bf16.msra.mxu0 %v2171_v47 }
 0x60b   :  { %2176 = vmatprep.subr.bf16.mxu0 %v2175_v51 }
 0x60e   :  { %2178 = vmatpush3.bf16.msra.mxu0 %v2175_v51 }
 0x6d4   :  { %v2008_v63 = vpop.f32.mrb[4].mxu0 }
 0x6d5   :  { %v647_v0 = vadd.f32 %v2008_v63, %v1830_v62  ;;  %v641_v1 = vpop.f32.mrb[5].mxu0 }
 0x6d6   :  { %v642_v2 = vadd.f32 %v1830_v62, %v641_v1 }
 0x6d7   :  { %v651_v3 = vadd.f32 %v647_v0, %v2433_v35 }
 0x6d8   :  { %v650_v4 = vadd.f32 %v642_v2, %v2429_v33  ;;  %v692_v33 = vld [vmem:[%s2753_s2 + $0x60] sm:$0xff] }
 0x6d9   :  { %v657_v5 = vsel %vm21_vm0, %v651_v3, 0.0  ;;  %v2155_v17 = vpack.c.bf16 %v693_v16, %v692_v33 }
 0x6da   :  { %658 = vadd.xlane.f32.xlu1 %v657_v5  ;;  %v654_v6 = vsel %vm21_vm0, %v650_v4, 0.0  ;;  %v1838_v5 = vld [vmem:[%s2753_s2 + $0xc8] ss:$0 sm:$0xff] }
 0x6db   :  { %655 = vadd.xlane.f32.xlu0 %v654_v6  ;;  %2156 = vmatprep.subr.bf16.mxu1 %v2155_v17 }
 0x6dc   :  { %2158 = vmatpush3.bf16.msra.mxu1 %v2155_v17 }
 0x6dd   :  { %2160 = vmatprep.subr.bf16.mxu1 %v2159_v20 }
 0x6e0   :  { %2162 = vmatpush3.bf16.msra.mxu1 %v2159_v20 }
 0x767   :  { %v659_v7 = vpop.xlane.xlu1 %658 }
 0x768   :  { %v661_v8 = vmul.f32 0.03125, %v659_v7  ;;  %v656_v9 = vpop.xlane.xlu0 %655 }
 0x769   :  { %v660_v10 = vmul.f32 0.03125, %v656_v9 }
 0x76a   :  { %v663_v11 = vsub.f32 %v651_v3, %v661_v8 }
 0x76b   :  { %v662_v12 = vsub.f32 %v650_v4, %v660_v10 }
 0x76c   :  { %v665_v15 = vmul.f32 %v663_v11, %v663_v11 }
 0x76d   :  { %v664_v13 = vmul.f32 %v662_v12, %v662_v12 }
 0x76e   :  { %v669_v35 = vsel %vm21_vm0, %v665_v15, 0.0 }
 0x76f   :  { %v666_v14 = vsel %vm21_vm0, %v664_v13, 0.0 }
 0x770   :  { %667 = vadd.xlane.f32.xlu0 %v666_v14 }
 0x774   :  { %670 = vadd.xlane.f32.xlu0 %v669_v35 }
 0x7fd   :  { %v668_v21 = vpop.xlane.xlu0 %667 }
 0x7fe   :  { %v672_v22 = vmul.f32 0.03125, %v668_v21 }
 0x800   :  { %v674_v23 = vadd.f32 1e-05, %v672_v22  ;;  %v929_v22 = vld [vmem:[%s2753_s2 + $0xd0] sm:$0xff] }
 0x801   :  { %v671_v24 = vpop.xlane.xlu0 %670 }
 0x802   :  { %2308 = vrsqrt.f32 %v674_v23  ;;  %v673_v25 = vmul.f32 0.03125, %v671_v24  ;;  %v930_v23 = vld [vmem:[%s2753_s2 + $0xd8] sm:$0xff] }
 0x803   :  { %v2179_v24 = vpack.c.bf16 %v930_v23, %v929_v22 }
 0x804   :  { %v675_v26 = vadd.f32 1e-05, %v673_v25  ;;  %v931_v25 = vld [vmem:[%s2753_s2 + $0xe0] sm:$0xff] }
 0x805   :  { %2180 = vmatprep.subr.bf16.mxu1 %v2179_v24 }
 0x806   :  { %2310 = vrsqrt.f32 %v675_v26  ;;  %v932_v26 = vld [vmem:[%s2753_s2 + $0xe8] sm:$0xff] }
 0x80c   :  { %v2309_v27 = vpop.eup %2308 }
 0x80d   :  { %v678_v29 = vmul.f32 %v2309_v27, %v662_v12  ;;  %v2183_v27 = vpack.c.bf16 %v932_v26, %v931_v25 }
 0x80f   :  { %v684_v31 = vmul.f32 %v1833_v28, %v678_v29 }
 0x810   :  { %v2311_v32 = vpop.eup %2310 }
 0x811   :  { %v679_v34 = vmul.f32 %v2311_v32, %v663_v11  ;;  %v690_v36 = vadd.f32 %v1834_v30, %v684_v31 }
 0x813   :  { %v685_v37 = vmul.f32 %v1833_v28, %v679_v34  ;;  %2017 = vmatprep.mubr.msk.f32.mxu1 %vm21_vm0, %v690_v36 }
 0x815   :  { %v691_v38 = vadd.f32 %v1834_v30, %v685_v37  ;;  %v1841_v37 = vld [vmem:[%s2753_s2 + $0x2] ss:$0 sm:$0xff] }
 0x817   :  { %2018 = vmatmul.mubr.msk.f32.vlgmr.msra.gmra.mrb[6].mxu1 %vm21_vm0, %v691_v38 }
 0x818   :  { %2182 = vmatpush3.bf16.msra.mxu1 %v2179_v24 }
 0x819   :  { %2184 = vmatprep.subr.bf16.mxu1 %v2183_v27 }
 0x81c   :  { %2186 = vmatpush3.bf16.msra.mxu1 %v2183_v27 }
 0x8ea   :  { %v2019_v55 = vpop.f32.mrb[6].mxu1 }
 0x8eb   :  { %v788_v56 = vadd.f32 %v2019_v55, %v1835_v52  ;;  %v782_v57 = vpop.f32.mrb[7].mxu1 }
 0x8ec   :  { %v783_v58 = vadd.f32 %v1835_v52, %v782_v57 }
 0x8ed   :  { %v794_v59 = vmul.f32 0.70710677, %v788_v56  ;;  %v792_v2 = vmul.f32 0.5, %v788_v56 }
 0x8ee   :  { %v793_v60 = vmul.f32 0.70710677, %v783_v58  ;;  %v791_v0 = vmul.f32 0.5, %v783_v58 }
 0x8ef   :  { %2312 = verf.f32 %v794_v59 }
 0x8f0   :  { %2314 = verf.f32 %v793_v60 }
 0x8f9   :  { %v2313_v61 = vpop.eup %2312 }
 0x8fa   :  { %v2315_v62 = vpop.eup %2314  ;;  %v798_v63 = vadd.f32 1.0, %v2313_v61 }
 0x8fb   :  { %v797_v1 = vadd.f32 1.0, %v2315_v62 }
 0x8fc   :  { %v800_v4 = vmul.f32 %v798_v63, %v792_v2 }
 0x8fd   :  { %v799_v3 = vmul.f32 %v797_v1, %v791_v0 }
 0x8ff   :  { %2036 = vmatprep.mubr.msk.f32.mxu0 %vm805_vm3, %v799_v3 }
 0x900   :  { %2037 = vmatmul.mubr.msk.f32.vlgmr.msra.gmra.mrb[6].mxu0 %vm805_vm3, %v800_v4 }
 0x9d3   :  { %v2038_v6 = vpop.f32.mrb[6].mxu0 }
 0x9d4   :  { %v884_v7 = vadd.f32 %v2038_v6, %v1838_v5  ;;  %v878_v8 = vpop.f32.mrb[7].mxu0 }
 0x9d5   :  { %v879_v9 = vadd.f32 %v1838_v5, %v878_v8 }
 0x9d6   :  { %v888_v10 = vadd.f32 %v884_v7, %v691_v38 }
 0x9d7   :  { %v887_v11 = vadd.f32 %v879_v9, %v690_v36 }
 0x9d8   :  { %v894_v12 = vsel %vm21_vm0, %v888_v10, 0.0 }
 0x9d9   :  { %895 = vadd.xlane.f32.xlu1 %v894_v12  ;;  %v891_v13 = vsel %vm21_vm0, %v887_v11, 0.0 }
 0x9da   :  { %892 = vadd.xlane.f32.xlu0 %v891_v13 }
 0xa66   :  { %v896_v14 = vpop.xlane.xlu1 %895 }
 0xa67   :  { %v898_v15 = vmul.f32 0.03125, %v896_v14  ;;  %v893_v35 = vpop.xlane.xlu0 %892 }
 0xa68   :  { %v897_v33 = vmul.f32 0.03125, %v893_v35 }
 0xa69   :  { %v900_v16 = vsub.f32 %v888_v10, %v898_v15 }
 0xa6a   :  { %v899_v17 = vsub.f32 %v887_v11, %v897_v33 }
 0xa6b   :  { %v902_v18 = vmul.f32 %v900_v16, %v900_v16 }
 0xa6c   :  { %v901_v19 = vmul.f32 %v899_v17, %v899_v17 }
 0xa6d   :  { %v906_v20 = vsel %vm21_vm0, %v902_v18, 0.0 }
 0xa6e   :  { %907 = vadd.xlane.f32.xlu1 %v906_v20  ;;  %v903_v21 = vsel %vm21_vm0, %v901_v19, 0.0 }
 0xa6f   :  { %904 = vadd.xlane.f32.xlu0 %v903_v21 }
 0xafb   :  { %v908_v28 = vpop.xlane.xlu1 %907 }
 0xafc   :  { %v910_v29 = vmul.f32 0.03125, %v908_v28  ;;  %v905_v30 = vpop.xlane.xlu0 %904 }
 0xafd   :  { %v909_v31 = vmul.f32 0.03125, %v905_v30 }
 0xafe   :  { %v912_v32 = vadd.f32 1e-05, %v910_v29 }
 0xaff   :  { %v911_v34 = vadd.f32 1e-05, %v909_v31 }
 0xb00   :  { %2316 = vrsqrt.f32 %v912_v32 }
 0xb01   :  { %2318 = vrsqrt.f32 %v911_v34 }
 0xb0a   :  { %v2317_v36 = vpop.eup %2316 }
 0xb0b   :  { %v2319_v38 = vpop.eup %2318  ;;  %v916_v39 = vmul.f32 %v2317_v36, %v900_v16 }
 0xb0c   :  { %v915_v40 = vmul.f32 %v2319_v38, %v899_v17 }
 0xb0d   :  { %v922_v42 = vmul.f32 %v1841_v37, %v916_v39 }
 0xb0e   :  { %v921_v43 = vmul.f32 %v1841_v37, %v915_v40 }
 0xb0f   :  { %v2599_v45 = vadd.f32 %v1842_v41, %v922_v42 }
 0xb10   :  { %v2597_v44 = vadd.f32 %v1842_v41, %v921_v43 }
 0xb12   :  { %2047 = vmatprep.mubr.msk.f32.mxu1 %vm21_vm0, %v2597_v44 }
 0xb13   :  { %2048 = vmatmul.mubr.msk.f32.vlgmr.msra.gmra.mrb[8].mxu1 %vm21_vm0, %v2599_v45 }
 0xbe6   :  { %v2049_v47 = vpop.f32.mrb[8].mxu1 }
 0xbe7   :  { %v1016_v49 = vadd.f32 %v2049_v47, %v1843_v46  ;;  %v1010_v50 = vpop.f32.mrb[9].mxu1 }
 0xbe8   :  { %v1011_v51 = vadd.f32 %v1843_v46, %v1010_v50 }
 0xbea   :  { %2054 = vmatprep.mubr.msk.f32.mxu1 %vm157_vm1, %v1011_v51  ;;  %v2609_v52 = vpack.i.bf16 %v1016_v49, %v1011_v51 }
 0xbec   :  { %2274 = vrot.lane.b32.xlu1 %v2609_v52, %s2372_s29  ;;  %2269 = vrot.lane.b32.xlu0 %v2609_v52, %s2373_s30 }
 0xbf0   :  { %1217 = vrot.lane.b32.xlu1 %v1011_v51, %s2374_s4 }
 0xbf4   :  { %1219 = vrot.lane.b32.xlu1 %v1016_v49, %s2374_s4 }
 0xc5e   :  { %v2275_v55 = vpop.permute.xlu1 %2274  ;;  %v2270_v56 = vpop.permute.xlu0 %2269 }
 0xc5f   :  { %v2277_v57 = vunpack.i.h.bf16 %v2275_v55  ;;  %v2276_v58 = vunpack.i.l.bf16 %v2275_v55  ;;  %v2272_v59 = vunpack.i.h.bf16 %v2270_v56  ;;  %v2271_v60 = vunpack.i.l.bf16 %v2270_v56  ;;  %v1427_v55 = vld [vmem:[%s2753_s2 + $0xf8] sm:$0xff]  ;;  %v1428_v56 = vld [vmem:[%s2753_s2 + $0x100] sm:$0xff] }
 0xc61   :  { %v2187_v61 = vpack.c.bf16 %v2272_v59, %v2271_v60  ;;  %v2197_v62 = vpack.c.bf16 %v2277_v57, %v2276_v58  ;;  %v2207_v57 = vpack.c.bf16 %v1428_v56, %v1427_v55  ;;  %v1429_v58 = vld [vmem:[%s2753_s2 + $0x108] sm:$0xff]  ;;  %v1430_v59 = vld [vmem:[%s2753_s2 + $0x110] sm:$0xff]  ;;  %v1570_v55 = vld [vmem:[%s2753_s2 + $0x178] sm:$0xff] }
 0xc62   :  { %v1218_v63 = vpop.permute.xlu1 %1217  ;;  %v2211_v60 = vpack.c.bf16 %v1430_v59, %v1429_v58  ;;  %v1571_v56 = vld [vmem:[%s2753_s2 + $0x180] sm:$0xff] }
 0xc63   :  { %2189 = vmatprep.subr.msk.bf16.mxu1 %vm2451_vm2, %v2187_v61  ;;  %v1863_v58 = vld [vmem:[%s2753_s2 + $0x140] ss:$0 sm:$0xff] }
 0xc64   :  { %2192 = vmatpush3.bf16.xpose.msk.msra.mxu1 %vm2451_vm2, %v2187_v61 }
 0xc65   :  { %2199 = vmatprep.subr.msk.bf16.mxu1 %vm2451_vm2, %v2197_v62 }
 0xc66   :  { %v1220_v0 = vpop.permute.xlu1 %1219 }
 0xc6b   :  { %2055 = vmatmul.mubr.msk.f32.vlgmr.msra.gmra.mrb[10].mxu1 %vm157_vm1, %v1016_v49 }
 0xc6c   :  { %2202 = vmatpush3.bf16.xpose.msk.msra.mxu1 %vm2451_vm2, %v2197_v62  ;;  %2068 = vmatprep.mubr.msk.f32.mxu1 %vm157_vm1, %v1218_v63 }
 0xc73   :  { %2069 = vmatmul.mubr.msk.f32.vlgmr.msra.gmra.mrb[12].mxu1 %vm157_vm1, %v1220_v0 }
 0xd3e   :  { %v2056_v1 = vpop.f32.mrb[10].mxu1 }
 0xd3f   :  { %v1105_v2 = vadd.f32 %v2056_v1, %v2469_v53  ;;  %v1099_v3 = vpop.f32.mrb[11].mxu1 }
 0xd40   :  { %v1100_v4 = vadd.f32 %v1099_v3, %v2474_v54 }
 0xd41   :  { %v1111_v5 = vsel %vm157_vm1, %v1105_v2, -inf }
 0xd42   :  { %1112 = vmax.xlane.f32.xlu1 %v1111_v5  ;;  %v1108_v6 = vsel %vm157_vm1, %v1100_v4, -inf  ;;  %v1858_v5 = vld [vmem:[%s2753_s2 + $0x118] ss:$0 sm:$0xff] }
 0xd43   :  { %1109 = vmax.xlane.f32.xlu0 %v1108_v6 }
 0xd46   :  { %v2070_v7 = vpop.f32.mrb[12].mxu1 }
 0xd47   :  { %v1299_v48 = vpop.f32.mrb[13].mxu1  ;;  %v1305_v9 = vadd.f32 %v2070_v7, %v2469_v53 }
 0xd48   :  { %v1300_v8 = vadd.f32 %v1299_v48, %v2474_v54 }
 0xd49   :  { %v1311_v11 = vsel %vm157_vm1, %v1305_v9, -inf }
 0xd4a   :  { %v1308_v10 = vsel %vm157_vm1, %v1300_v8, -inf }
 0xd4b   :  { %1309 = vmax.xlane.f32.xlu0 %v1308_v10 }
 0xd4f   :  { %1312 = vmax.xlane.f32.xlu0 %v1311_v11 }
 0xdcf   :  { %v1113_v12 = vpop.xlane.xlu1 %1112 }
 0xdd0   :  { %v1115_v13 = vsub.f32 %v1105_v2, %v1113_v12  ;;  %v1110_v14 = vpop.xlane.xlu0 %1109 }
 0xdd1   :  { %v1114_v15 = vsub.f32 %v1100_v4, %v1110_v14 }
 0xdd2   :  { %v1118_v35 = vmul.f32 1.442695, %v1115_v13 }
 0xdd3   :  { %v1116_v33 = vmul.f32 1.442695, %v1114_v15 }
 0xdd4   :  { %2320 = vpow2.f32 %v1118_v35 }
 0xdd5   :  { %2322 = vpow2.f32 %v1116_v33 }
 0xdd8   :  { %v1310_v16 = vpop.xlane.xlu0 %1309 }
 0xdd9   :  { %v1314_v17 = vsub.f32 %v1300_v8, %v1310_v16 }
 0xddb   :  { %v1316_v18 = vmul.f32 1.442695, %v1314_v17 }
 0xddc   :  { %v1313_v54 = vpop.xlane.xlu0 %1312 }
 0xddd   :  { %2324 = vpow2.f32 %v1316_v18  ;;  %v1315_v53 = vsub.f32 %v1305_v9, %v1313_v54 }
 0xdde   :  { %v2321_v19 = vpop.eup %2320 }
 0xddf   :  { %v2323_v20 = vpop.eup %2322  ;;  %v1318_v21 = vmul.f32 1.442695, %v1315_v53  ;;  %v1123_v22 = vsel %vm157_vm1, %v2321_v19, 0.0  ;;  %v1560_v53 = vld [vmem:[%s2753_s2 + $0x128] sm:$0xff] }
 0xde0   :  { %1124 = vadd.xlane.f32.xlu1 %v1123_v22  ;;  %v1120_v23 = vsel %vm157_vm1, %v2323_v20, 0.0 }
 0xde1   :  { %2326 = vpow2.f32 %v1318_v21  ;;  %1121 = vadd.xlane.f32.xlu0 %v1120_v23  ;;  %v1562_v21 = vld [vmem:[%s2753_s2 + $0x138] sm:$0xff] }
 0xde7   :  { %v2325_v24 = vpop.eup %2324 }
 0xde8   :  { %v1320_v25 = vsel %vm157_vm1, %v2325_v24, 0.0 }
 0xde9   :  { %1321 = vadd.xlane.f32.xlu0 %v1320_v25 }
 0xdeb   :  { %v2327_v26 = vpop.eup %2326 }
 0xdec   :  { %v1323_v27 = vsel %vm157_vm1, %v2327_v26, 0.0 }
 0xded   :  { %1324 = vadd.xlane.f32.xlu1 %v1323_v27 }
 0xdfe   :  { %2284 = vrot.lane.b32.xlu1 %v2609_v52, %s2375_s1 }
 0xdff   :  { %2279 = vrot.lane.b32.xlu0 %v2609_v52, %s2376_s9 }
 0xe6d   :  { %v1125_v29 = vpop.xlane.xlu1 %1124 }
 0xe6e   :  { %v1122_v28 = vpop.xlane.xlu0 %1121 }
 0xe6f   :  { %2328 = vrcp.f32 %v1122_v28 }
 0xe70   :  { %2330 = vrcp.f32 %v1125_v29 }
 0xe76   :  { %v1322_v30 = vpop.xlane.xlu0 %1321 }
 0xe77   :  { %2332 = vrcp.f32 %v1322_v30  ;;  %v1861_v30 = vld [vmem:[%s2753_s2 + $0x3] ss:$0 sm:$0xff] }
 0xe79   :  { %v2329_v31 = vpop.eup %2328 }
 0xe7a   :  { %v1325_v32 = vpop.xlane.xlu1 %1324  ;;  %v2280_v34 = vpop.permute.xlu0 %2279  ;;  %v1128_v36 = vmul.f32 %v2329_v31, %v2323_v20  ;;  %v1561_v20 = vld [vmem:[%s2753_s2 + $0x130] sm:$0xff] }
 0xe7b   :  { %2334 = vrcp.f32 %v1325_v32  ;;  %v2282_v37 = vunpack.i.h.bf16 %v2280_v34  ;;  %v2281_v38 = vunpack.i.l.bf16 %v2280_v34  ;;  %v2331_v40 = vpop.eup %2330  ;;  %v2219_v22 = vpack.c.bf16 %v1562_v21, %v1561_v20  ;;  %v1862_v32 = vld [vmem:[%s2753_s2 + $0xb] ss:$0 sm:$0xff] }
 0xe7c   :  { %2061 = vmatprep.mubr.msk.f32.mxu0 %vm157_vm1, %v1128_v36  ;;  %v1129_v47 = vmul.f32 %v2331_v40, %v2321_v19 }
 0xe7d   :  { %v2193_v39 = vpack.c.bf16 %v2282_v37, %v2281_v38 }
 0xe7e   :  { %v2285_v41 = vpop.permute.xlu1 %2284 }
 0xe7f   :  { %v2287_v42 = vunpack.i.h.bf16 %v2285_v41  ;;  %v2286_v43 = vunpack.i.l.bf16 %v2285_v41  ;;  %2194 = vmatprep.subr.bf16.mxu0 %v2193_v39  ;;  %v1564_v41 = vld [vmem:[%s2753_s2 + $0x148] sm:$0xff] }
 0xe80   :  { %2196 = vmatpush3.bf16.msra.mxu0 %v2193_v39 }
 0xe81   :  { %v2333_v46 = vpop.eup %2332  ;;  %v2203_v49 = vpack.c.bf16 %v2287_v42, %v2286_v43  ;;  %v1565_v42 = vld [vmem:[%s2753_s2 + $0x150] sm:$0xff] }
 0xe82   :  { %v1328_v50 = vmul.f32 %v2333_v46, %v2325_v24  ;;  %v2223_v43 = vpack.c.bf16 %v1565_v42, %v1564_v41  ;;  %v1566_v46 = vld [vmem:[%s2753_s2 + $0x158] sm:$0xff] }
 0xe83   :  { %2062 = vmatmul.mubr.msk.f32.vlgmr.msra.gmra.mrb[8].mxu0 %vm157_vm1, %v1129_v47  ;;  %2204 = vmatprep.subr.bf16.mxu0 %v2203_v49  ;;  %v1567_v47 = vld [vmem:[%s2753_s2 + $0x160] sm:$0xff] }
 0xe84   :  { %2206 = vmatpush3.bf16.msra.mxu0 %v2203_v49  ;;  %2075 = vmatprep.mubr.msk.f32.mxu0 %vm157_vm1, %v1328_v50  ;;  %v2227_v49 = vpack.c.bf16 %v1567_v47, %v1566_v46  ;;  %v1568_v50 = vld [vmem:[%s2753_s2 + $0x168] sm:$0xff] }
 0xe85   :  { %v2335_v51 = vpop.eup %2334  ;;  %2208 = vmatprep.subr.bf16.mxu0 %v2207_v57 }
 0xe86   :  { %v1329_v52 = vmul.f32 %v2335_v51, %v2327_v26  ;;  %v1569_v51 = vld [vmem:[%s2753_s2 + $0x170] sm:$0xff] }
 0xe88   :  { %2076 = vmatmul.mubr.msk.f32.vlgmr.msra.gmra.mrb[10].mxu0 %vm157_vm1, %v1329_v52  ;;  %v2231_v52 = vpack.c.bf16 %v1569_v51, %v1568_v50 }
 0xe89   :  { %2210 = vmatpush3.bf16.msra.mxu0 %v2207_v57  ;;  %v2235_v57 = vpack.c.bf16 %v1571_v56, %v1570_v55 }
 0xe8a   :  { %2212 = vmatprep.subr.bf16.mxu0 %v2211_v60 }
 0xe8d   :  { %2214 = vmatpush3.bf16.msra.mxu0 %v2211_v60 }
 0xe8e   :  { %2224 = vmatprep.subr.bf16.mxu0 %v2223_v43 }
 0xf56   :  { %v2063_v61 = vpop.f32.mrb[8].mxu0 }
 0xf57   :  { %v1208_v62 = vpop.f32.mrb[9].mxu0 }
 0xf5b   :  { %v2077_v63 = vpop.f32.mrb[10].mxu0 }
 0xf5c   :  { %v1408_v0 = vpop.f32.mrb[11].mxu0 }
 0xf5d   :  { %1419 = vrot.lane.b32.xlu1 %v1408_v0, %s2377_s17 }
 0xf61   :  { %1421 = vrot.lane.b32.xlu1 %v2077_v63, %s2377_s17 }
 0xfcf   :  { %v1420_v1 = vpop.permute.xlu1 %1419 }
 0xfd0   :  { %v1425_v2 = vsel %vm157_vm1, %v1208_v62, %v1420_v1 }
 0xfd1   :  { %2086 = vmatprep.mubr.msk.f32.mxu0 %vm21_vm0, %v1425_v2 }
 0xfd3   :  { %v1422_v3 = vpop.permute.xlu1 %1421 }
 0xfd4   :  { %v1426_v4 = vsel %vm157_vm1, %v2063_v61, %v1422_v3 }
 0xfd5   :  { %2087 = vmatmul.mubr.msk.f32.vlgmr.msra.gmra.mrb[12].mxu0 %vm21_vm0, %v1426_v4 }
 0xfd6   :  { %2226 = vmatpush3.bf16.msra.mxu0 %v2223_v43 }
 0xfd7   :  { %2228 = vmatprep.subr.bf16.mxu0 %v2227_v49 }
 0xfda   :  { %2230 = vmatpush3.bf16.msra.mxu0 %v2227_v49 }
 0xfdb   :  { %2232 = vmatprep.subr.bf16.mxu0 %v2231_v52 }
 0xfde   :  { %2234 = vmatpush3.bf16.msra.mxu0 %v2231_v52 }
 0xfdf   :  { %2236 = vmatprep.subr.bf16.mxu0 %v2235_v57 }
 0xfe2   :  { %2238 = vmatpush3.bf16.msra.mxu0 %v2235_v57 }
0x10a8   :  { %v2088_v6 = vpop.f32.mrb[12].mxu0 }
0x10a9   :  { %v1514_v7 = vadd.f32 %v2088_v6, %v1858_v5  ;;  %v1508_v48 = vpop.f32.mrb[13].mxu0 }
0x10aa   :  { %v1509_v8 = vadd.f32 %v1858_v5, %v1508_v48 }
0x10ab   :  { %v1518_v9 = vadd.f32 %v1514_v7, %v2599_v45 }
0x10ac   :  { %v1517_v10 = vadd.f32 %v1509_v8, %v2597_v44  ;;  %v1559_v44 = vld [vmem:[%s2753_s2 + $0x120] sm:$0xff]  ;;  %v1866_v8 = vld [vmem:[%s2753_s2 + $0x188] ss:$0 sm:$0xff] }
0x10ad   :  { %v1524_v11 = vsel %vm21_vm0, %v1518_v9, 0.0  ;;  %v2215_v19 = vpack.c.bf16 %v1560_v53, %v1559_v44 }
0x10ae   :  { %1525 = vadd.xlane.f32.xlu1 %v1524_v11  ;;  %v1521_v12 = vsel %vm21_vm0, %v1517_v10, 0.0 }
0x10af   :  { %1522 = vadd.xlane.f32.xlu0 %v1521_v12  ;;  %2216 = vmatprep.subr.bf16.mxu1 %v2215_v19 }
0x10b0   :  { %2218 = vmatpush3.bf16.msra.mxu1 %v2215_v19 }
0x10b1   :  { %2220 = vmatprep.subr.bf16.mxu1 %v2219_v22 }
0x10b4   :  { %2222 = vmatpush3.bf16.msra.mxu1 %v2219_v22 }
0x113b   :  { %v1526_v13 = vpop.xlane.xlu1 %1525 }
0x113c   :  { %v1528_v14 = vmul.f32 0.03125, %v1526_v13  ;;  %v1523_v15 = vpop.xlane.xlu0 %1522 }
0x113d   :  { %v1527_v35 = vmul.f32 0.03125, %v1523_v15 }
0x113e   :  { %v1530_v33 = vsub.f32 %v1518_v9, %v1528_v14 }
0x113f   :  { %v1529_v16 = vsub.f32 %v1517_v10, %v1527_v35 }
0x1140   :  { %v1532_v54 = vmul.f32 %v1530_v33, %v1530_v33 }
0x1141   :  { %v1531_v17 = vmul.f32 %v1529_v16, %v1529_v16 }
0x1142   :  { %v1536_v45 = vsel %vm21_vm0, %v1532_v54, 0.0 }
0x1143   :  { %v1533_v18 = vsel %vm21_vm0, %v1531_v17, 0.0 }
0x1144   :  { %1534 = vadd.xlane.f32.xlu0 %v1533_v18 }
0x1148   :  { %1537 = vadd.xlane.f32.xlu0 %v1536_v45 }
0x11d1   :  { %v1535_v23 = vpop.xlane.xlu0 %1534 }
0x11d2   :  { %v1539_v24 = vmul.f32 0.03125, %v1535_v23 }
0x11d4   :  { %v1541_v25 = vadd.f32 1e-05, %v1539_v24 }
0x11d5   :  { %v1538_v26 = vpop.xlane.xlu0 %1537 }
0x11d6   :  { %2336 = vrsqrt.f32 %v1541_v25  ;;  %v1540_v27 = vmul.f32 0.03125, %v1538_v26 }
0x11d8   :  { %v1542_v28 = vadd.f32 1e-05, %v1540_v27 }
0x11da   :  { %2338 = vrsqrt.f32 %v1542_v28  ;;  %v1869_v28 = vld [vmem:[%s2753_s2 + $0x4] ss:$0 sm:$0xff] }
0x11e0   :  { %v2337_v29 = vpop.eup %2336 }
0x11e1   :  { %v1545_v31 = vmul.f32 %v2337_v29, %v1529_v16 }
0x11e3   :  { %v1551_v34 = vmul.f32 %v1861_v30, %v1545_v31 }
0x11e4   :  { %v2339_v36 = vpop.eup %2338 }
0x11e5   :  { %v1546_v37 = vmul.f32 %v2339_v36, %v1530_v33  ;;  %v1557_v38 = vadd.f32 %v1862_v32, %v1551_v34 }
0x11e7   :  { %v1552_v39 = vmul.f32 %v1861_v30, %v1546_v37  ;;  %2097 = vmatprep.mubr.msk.f32.mxu1 %vm21_vm0, %v1557_v38 }
0x11e9   :  { %v1558_v40 = vadd.f32 %v1862_v32, %v1552_v39  ;;  %v1870_v32 = vld [vmem:[%s2753_s2 + $0xc] ss:$0 sm:$0xff] }
0x11eb   :  { %2098 = vmatmul.mubr.msk.f32.vlgmr.msra.gmra.mrb[14].mxu1 %vm21_vm0, %v1558_v40 }
0x12be   :  { %v2099_v59 = vpop.f32.mrb[14].mxu1 }
0x12bf   :  { %v1655_v60 = vadd.f32 %v2099_v59, %v1863_v58  ;;  %v1649_v61 = vpop.f32.mrb[15].mxu1 }
0x12c0   :  { %v1650_v62 = vadd.f32 %v1863_v58, %v1649_v61 }
0x12c1   :  { %v1661_v63 = vmul.f32 0.70710677, %v1655_v60  ;;  %v1659_v6 = vmul.f32 0.5, %v1655_v60 }
0x12c2   :  { %v1660_v0 = vmul.f32 0.70710677, %v1650_v62  ;;  %v1658_v4 = vmul.f32 0.5, %v1650_v62 }
0x12c3   :  { %2340 = verf.f32 %v1661_v63 }
0x12c4   :  { %2342 = verf.f32 %v1660_v0 }
0x12cd   :  { %v2341_v1 = vpop.eup %2340 }
0x12ce   :  { %v2343_v2 = vpop.eup %2342  ;;  %v1665_v3 = vadd.f32 1.0, %v2341_v1 }
0x12cf   :  { %v1664_v5 = vadd.f32 1.0, %v2343_v2 }
0x12d0   :  { %v1667_v48 = vmul.f32 %v1665_v3, %v1659_v6 }
0x12d1   :  { %v1666_v7 = vmul.f32 %v1664_v5, %v1658_v4 }
0x12d3   :  { %2116 = vmatprep.mubr.msk.f32.mxu0 %vm805_vm3, %v1666_v7 }
0x12d4   :  { %2117 = vmatmul.mubr.msk.f32.vlgmr.msra.gmra.mrb[14].mxu0 %vm805_vm3, %v1667_v48 }
0x13a7   :  { %v2118_v9 = vpop.f32.mrb[14].mxu0 }
0x13a8   :  { %v1750_v10 = vadd.f32 %v2118_v9, %v1866_v8  ;;  %v1744_v11 = vpop.f32.mrb[15].mxu0 }
0x13a9   :  { %v1745_v12 = vadd.f32 %v1866_v8, %v1744_v11 }
0x13aa   :  { %v1754_v13 = vadd.f32 %v1750_v10, %v1558_v40 }
0x13ab   :  { %v1753_v14 = vadd.f32 %v1745_v12, %v1557_v38 }
0x13ac   :  { %v1760_v15 = vsel %vm21_vm0, %v1754_v13, 0.0 }
0x13ad   :  { %1761 = vadd.xlane.f32.xlu1 %v1760_v15  ;;  %v1757_v35 = vsel %vm21_vm0, %v1753_v14, 0.0 }
0x13ae   :  { %1758 = vadd.xlane.f32.xlu0 %v1757_v35 }
0x143a   :  { %v1762_v33 = vpop.xlane.xlu1 %1761 }
0x143b   :  { %v1764_v16 = vmul.f32 0.03125, %v1762_v33  ;;  %v1759_v17 = vpop.xlane.xlu0 %1758 }
0x143c   :  { %v1763_v18 = vmul.f32 0.03125, %v1759_v17 }
0x143d   :  { %v1766_v54 = vsub.f32 %v1754_v13, %v1764_v16 }
0x143e   :  { %v1765_v45 = vsub.f32 %v1753_v14, %v1763_v18 }
0x143f   :  { %v1768_v44 = vmul.f32 %v1766_v54, %v1766_v54 }
0x1440   :  { %v1767_v53 = vmul.f32 %v1765_v45, %v1765_v45 }
0x1441   :  { %v1772_v19 = vsel %vm21_vm0, %v1768_v44, 0.0 }
0x1442   :  { %1773 = vadd.xlane.f32.xlu1 %v1772_v19  ;;  %v1769_v20 = vsel %vm21_vm0, %v1767_v53, 0.0 }
0x1443   :  { %1770 = vadd.xlane.f32.xlu0 %v1769_v20 }
0x14cf   :  { %v1774_v21 = vpop.xlane.xlu1 %1773 }
0x14d0   :  { %v1776_v22 = vmul.f32 0.03125, %v1774_v21  ;;  %v1771_v23 = vpop.xlane.xlu0 %1770 }
0x14d1   :  { %v1775_v24 = vmul.f32 0.03125, %v1771_v23 }
0x14d2   :  { %v1778_v25 = vadd.f32 1e-05, %v1776_v22 }
0x14d3   :  { %v1777_v26 = vadd.f32 1e-05, %v1775_v24 }
0x14d4   :  { %2344 = vrsqrt.f32 %v1778_v25 }
0x14d5   :  { %2346 = vrsqrt.f32 %v1777_v26 }
0x14de   :  { %v2345_v27 = vpop.eup %2344 }
0x14df   :  { %v2347_v29 = vpop.eup %2346  ;;  %v1782_v30 = vmul.f32 %v2345_v27, %v1766_v54 }
0x14e0   :  { %v1781_v31 = vmul.f32 %v2347_v29, %v1765_v45 }
0x14e1   :  { %v1788_v34 = vmul.f32 %v1869_v28, %v1782_v30 }
0x14e2   :  { %v1787_v36 = vmul.f32 %v1869_v28, %v1781_v31 }
0x14e3   :  { %v1794_v37 = vadd.f32 %v1870_v32, %v1788_v34 }
0x14e4   :  { %v1793_v38 = vadd.f32 %v1870_v32, %v1787_v36 }
0x14e5   :  { %1796 = vst.msk [vmem:[#allocation2 + $0x8] sm:$0xff] %vm21_vm0, %v1794_v37 }
0x14e6   :  { %1795 = vst.msk [vmem:[#allocation2] sm:$0xff] %vm21_vm0, %v1793_v38 }
0x14e7   :  { %2359 = shalt.err (!%p2356_p4)
}
0x14e8   :  { %s2360_s12 = scalar_lea.hbm %s2754_s3, 256 }
0x14e9   :  { %p2361_p5 = scmp.ne.s32.totalorder %s2754_s3, %s2360_s12  ;;  %p2364_p6 = scmp.lt.u32.totalorder %s2360_s12, %s2754_s3 }
0x14eb   :  { %p2366_p7 = pnand %p2364_p6, %p2361_p5 }
0x14ed   :  { %2369 = shalt.err (!%p2366_p7)
}
0x14ee   :  { %s2379_s16 = smov 128   ;;  %s2380_s18 = smov 8  }
0x14ef   :  { %1808 = dma.vmem_to_hbm [thread:$0]  %s1803_s8, 256, %s2754_s3, [#allocation3], %s2379_s16, %s2379_s16, %s2380_s18  }
0x14f0   :  { %2370 = dma.done.wait [#allocation3], 256  }
0x14f1   :  { %2371 = vsyncadd [#allocation3], 4294967040 }
0x14f2   :  { %1812 = vsyncpa [#allocation3], 1 }

</bundles_post_ra>
